<compile_context>
chip_gen: v5e
topology: v5e:2x2
jax: 0.10.0
libtpu: 0.0.40
codegen_flags: <defaults>
</compile_context>

<pallas_src>
import functools
import math

import jax
import jax.numpy as jnp
from jax.experimental import pallas as pl
from jax.experimental.pallas import tpu as pltpu


def _round_up(n, m):
    return ((n + m - 1) // m) * m


def _pad_rows(a, n):
    pad = n - a.shape[0]
    return a if pad == 0 else jnp.pad(a, ((0, pad), (0, 0)))


def _pick_batch_tile(B_pad, max_tile=128):
    """Largest batch tile <= max_tile that divides B_pad (B_pad is a multiple of 8).

    Bigger tiles fill more MXU rows per vmatmul push and cut grid-step overhead;
    128 keeps carried-state vreg pressure bounded.  (For v7x one may additionally
    want num_b_tiles % 2 == 0 so both TensorCores get 'parallel' grid steps.)
    """
    if B_pad <= max_tile:
        return B_pad
    for t in range(max_tile, 0, -8):
        if B_pad % t == 0:
            return t
    return 8


def _pick_time_chunk(seq_len, output_dim, max_unroll=16, hard_max_unroll=64):
    """Return (seq_chunk, seq_pad).

    The lane-dense error output block is (b_tile, seq_chunk*output_dim), so
    seq_chunk*output_dim must be a multiple of 128 unless a single chunk covers
    the whole (possibly padded) sequence.  Unroll depth is bounded to keep code
    size / vreg pressure in check; awkward seq_len is padded (the padded steps'
    errors are discarded in the wrapper).
    """
    if seq_len <= max_unroll:
        return seq_len, seq_len
    # Prefer a divisor of seq_len (no padding) with a 128-lane-aligned output block.
    for t in range(max_unroll, 0, -1):
        if seq_len % t == 0 and (t * output_dim) % 128 == 0:
            return t, seq_len
    # Otherwise pad the sequence to a multiple of the smallest lane-aligned chunk.
    base = 128 // math.gcd(128, output_dim)  # smallest t with t*output_dim % 128 == 0
    t = min(max(base, (max_unroll // base) * base), hard_max_unroll)
    if (t * output_dim) % 128 == 0:
        return t, _round_up(seq_len, t)
    # TODO(synk): pathological output_dim (odd) with long seq_len falls back to a
    #             single fully-unrolled chunk; compile time may suffer there.
    return seq_len, seq_len


def _make_kernel(*, seq_chunk, b_tile, C, S, O, tau_h, alpha_x, alpha_h, alpha_hp):
    inv_tau = 1.0 / tau_h
    leak = 1.0 - inv_tau

    def kernel(x_ref, h0_ref, c0_ref, w_cT_ref, w_rT_ref, w_oT_ref,
               w_o_b_ref, w_c_b_ref, b_r_ref, b_o_ref,
               err_ref, h_scr, hp_scr, c_scr):
        ci = pl.program_id(1)  # time-chunk index (innermost, "arbitrary")

        # (Re-)initialize the carried state at the first chunk of each batch tile.
        @pl.when(ci == 0)
        def _():
            h_scr[...] = h0_ref[...]
            hp_scr[...] = jnp.zeros_like(hp_scr)
            c_scr[...] = c0_ref[...]

        # ---- hoisted: once per chunk, outside the unrolled time loop ----
        w_cT = w_cT_ref[...]                                 # (C, S) bf16
        w_rT = w_rT_ref[...]                                 # (S, S) bf16
        w_oT = w_oT_ref[...]                                 # (S, O) bf16
        b_r = jnp.broadcast_to(b_r_ref[...], (b_tile, S))    # (b_tile, S) f32
        b_o = jnp.broadcast_to(b_o_ref[...], (b_tile, O))    # (b_tile, O) f32
        if alpha_x > 0:
            w_o_b = w_o_b_ref[...]                           # (O, S) bf16: error    @ w_o
            w_c_b = w_c_b_ref[...]                           # (S, C) bf16: error_hp @ w_c

        h = h_scr[...]
        hp = hp_scr[...]
        c = c_scr[...]

        for t in range(seq_chunk):  # static, fully unrolled (bounded by _pick_time_chunk)
            # hp_prior = (1-1/tau)*hp + 1/tau*(tanh(h) @ w_r.T + c @ w_c.T + b_r - h)
            drive = (jnp.dot(c.astype(jnp.bfloat16), w_cT,
                             preferred_element_type=jnp.float32)
                     + jnp.dot(jnp.tanh(h).astype(jnp.bfloat16), w_rT,
                               preferred_element_type=jnp.float32))       # (b_tile, S)
            hp_prior = leak * hp + inv_tau * (drive + b_r - h)
            h_prior = h + hp_prior

            th = jnp.tanh(h_prior)
            x_pred = jnp.dot(th.astype(jnp.bfloat16), w_oT,
                             preferred_element_type=jnp.float32) + b_o    # (b_tile, O)
            error = x_pred - x_ref[t]                                     # (b_tile, O)

            # Direct per-step store at a static lane offset — no errs list / concat.
            err_ref[:, t * O:(t + 1) * O] = error

            if alpha_x > 0:
                grad = jnp.dot(error.astype(jnp.bfloat16), w_o_b,
                               preferred_element_type=jnp.float32)        # (b_tile, S)
                h_post = h_prior - alpha_x * (1.0 - th * th) * grad
                error_h = h_prior - h_post
                hp_post = hp_prior - alpha_h * error_h
                error_hp = hp_prior - hp_post
                c = c - alpha_hp * jnp.dot(error_hp.astype(jnp.bfloat16), w_c_b,
                                           preferred_element_type=jnp.float32)
                h, hp = h_post, hp_post
            else:
                h, hp = h_prior, hp_prior

        # Carry state to the next chunk.
        h_scr[...] = h
        hp_scr[...] = hp
        c_scr[...] = c

    return kernel


@functools.partial(jax.jit, static_argnames=("tau_h", "alpha_x", "alpha_h", "alpha_hp"))
def pc_rnn_forward(x, c_init, h_init, w_o, b_o, w_c, w_r, b_r,
                   *, tau_h, alpha_x, alpha_h, alpha_hp):
    """Returns errors of shape (seq_len, batch, output_dim), matching the module."""
    seq_len, B, O = x.shape
    S = w_r.shape[0]
    C = w_c.shape[1]

    # ---- glue: pad / cast once outside the kernel ----
    B_pad = _round_up(B, 8)                       # sublane-align the batch
    seq_chunk, seq_pad = _pick_time_chunk(seq_len, O)
    num_chunks = seq_pad // seq_chunk

    x_p = x.astype(jnp.float32)
    if seq_pad != seq_len or B_pad != B:
        x_p = jnp.pad(x_p, ((0, seq_pad - seq_len), (0, B_pad - B), (0, 0)))
    h0 = _pad_rows(h_init.astype(jnp.float32), B_pad)
    c0 = _pad_rows(c_init.astype(jnp.float32), B_pad)

    # Both orientations shipped pre-transposed (KB-scale weights; no in-kernel XLU work).
    w_cT = jnp.asarray(w_c, jnp.float32).T.astype(jnp.bfloat16)   # (C, S)
    w_rT = jnp.asarray(w_r, jnp.float32).T.astype(jnp.bfloat16)   # (S, S)
    w_oT = jnp.asarray(w_o, jnp.float32).T.astype(jnp.bfloat16)   # (S, O)
    w_o_b = jnp.asarray(w_o, jnp.float32).astype(jnp.bfloat16)    # (O, S)
    w_c_b = jnp.asarray(w_c, jnp.float32).astype(jnp.bfloat16)    # (S, C)
    b_r2 = jnp.asarray(b_r, jnp.float32).reshape(1, S)
    b_o2 = jnp.asarray(b_o, jnp.float32).reshape(1, O)

    b_tile = _pick_batch_tile(B_pad)
    num_b_tiles = B_pad // b_tile

    kernel = _make_kernel(seq_chunk=seq_chunk, b_tile=b_tile, C=C, S=S, O=O,
                          tau_h=float(tau_h), alpha_x=float(alpha_x),
                          alpha_h=float(alpha_h), alpha_hp=float(alpha_hp))

    grid_spec = pltpu.PrefetchScalarGridSpec(
        num_scalar_prefetch=0,
        grid=(num_b_tiles, num_chunks),
        in_specs=[
            # x as a 3-D block; per-step read is a free static leading-axis index.
            pl.BlockSpec((seq_chunk, b_tile, O), lambda bi, ci: (ci, bi, 0)),
            pl.BlockSpec((b_tile, S), lambda bi, ci: (bi, 0)),            # h_init
            pl.BlockSpec((b_tile, C), lambda bi, ci: (bi, 0)),            # c_init
            pl.BlockSpec((C, S), lambda bi, ci: (0, 0)),                  # w_c.T  bf16
            pl.BlockSpec((S, S), lambda bi, ci: (0, 0)),                  # w_r.T  bf16
            pl.BlockSpec((S, O), lambda bi, ci: (0, 0)),                  # w_o.T  bf16
            pl.BlockSpec((O, S), lambda bi, ci: (0, 0)),                  # w_o    bf16 (backward)
            pl.BlockSpec((S, C), lambda bi, ci: (0, 0)),                  # w_c    bf16 (backward)
            pl.BlockSpec((1, S), lambda bi, ci: (0, 0)),                  # b_r
            pl.BlockSpec((1, O), lambda bi, ci: (0, 0)),                  # b_o
        ],
        # Lane-dense error output: (b_tile, seq_chunk*O) per chunk.
        out_specs=pl.BlockSpec((b_tile, seq_chunk * O), lambda bi, ci: (bi, ci)),
        scratch_shapes=[
            pltpu.VMEM((b_tile, S), jnp.float32),   # h carry   (f32)
            pltpu.VMEM((b_tile, S), jnp.float32),   # hp carry  (f32)
            pltpu.VMEM((b_tile, C), jnp.float32),   # c carry   (f32)
        ],
    )

    err_packed = pl.pallas_call(
        kernel,
        out_shape=jax.ShapeDtypeStruct((B_pad, seq_pad * O), jnp.float32),
        grid_spec=grid_spec,
        compiler_params=pltpu.CompilerParams(
            dimension_semantics=("parallel", "arbitrary")),  # batch parallel, time sequential
    )(x_p, h0, c0, w_cT, w_rT, w_oT, w_o_b, w_c_b, b_r2, b_o2)

    # Unpack the lane-dense output: (B_pad, seq_pad*O) -> (seq_len, B, O).
    errors = (err_packed[:B]
              .reshape(B, seq_pad, O)[:, :seq_len]
              .transpose(1, 0, 2))
    return errors


def pc_rnn_forward_ref(x, c_init, h_init, w_o, b_o, w_c, w_r, b_r, *,
                       tau_h, alpha_x, alpha_h, alpha_hp, matmul_dtype=jnp.float32):
    """Pure-JAX reference mirroring the PyTorch forward (optionally with bf16 dots)."""
    def mm(a, b):
        return jnp.dot(a.astype(matmul_dtype), b.astype(matmul_dtype),
                       preferred_element_type=jnp.float32)

    seq_len = x.shape[0]
    old_h = h_init
    old_hp = jnp.zeros_like(h_init)
    c = c_init
    errors = []
    for t in range(seq_len):
        hp_prior = (1 - 1 / tau_h) * old_hp + (1 / tau_h) * (
            mm(jnp.tanh(old_h), w_r.T) + mm(c, w_c.T) + b_r[None, :] - old_h)
        h_prior = old_h + hp_prior
        x_pred = mm(jnp.tanh(h_prior), w_o.T) + b_o[None, :]
        error = x_pred - x[t]
        errors.append(error)
        if alpha_x > 0:
            h_post = h_prior - alpha_x * (1 - jnp.tanh(h_prior) ** 2) * mm(error, w_o)
            error_h = h_prior - h_post
            hp_post = hp_prior - alpha_h * error_h
            error_hp = hp_prior - hp_post
            c = c - alpha_hp * mm(error_hp, w_c)
            old_h, old_hp = h_post, hp_post
        else:
            old_h, old_hp = h_prior, hp_prior
    return jnp.stack(errors, axis=0)


if __name__ == "__main__":
    # Module hyper-parameters (small, consistent with the reference forward).
    causes_dim, states_dim, output_dim = 8, 32, 16
    seq_len, batch = 8, 4
    tau_h, alpha_x, alpha_h, alpha_hp = 2.0, 0.1, 0.1, 0.01

    key = jax.random.PRNGKey(0)
    k = jax.random.split(key, 8)

    # Deterministic synthetic parameters (matching PyTorch __init__ shapes/scales).
    w_o = jax.random.normal(k[0], (output_dim, states_dim), jnp.float32) / states_dim
    b_o = jax.random.normal(k[1], (output_dim,), jnp.float32) / 10
    w_c = jax.random.normal(k[2], (states_dim, causes_dim), jnp.float32) / causes_dim
    w_r = jax.random.normal(k[3], (states_dim, states_dim), jnp.float32) / states_dim
    b_r = jax.random.normal(k[4], (states_dim,), jnp.float32) / 10

    # Inputs.
    x = jax.random.normal(k[5], (seq_len, batch, output_dim), jnp.float32)
    c_init = jax.random.normal(k[6], (batch, causes_dim), jnp.float32)
    h_init = jax.random.normal(k[7], (batch, states_dim), jnp.float32)

    errors = pc_rnn_forward(
        x, c_init, h_init, w_o, b_o, w_c, w_r, b_r,
        tau_h=tau_h, alpha_x=alpha_x, alpha_h=alpha_h, alpha_hp=alpha_hp)
    errors = jax.block_until_ready(errors)
    assert errors.shape == (seq_len, batch, output_dim)

    # Reference with the same bf16 matmul-operand rounding (tight check of kernel logic).
    ref_bf16 = pc_rnn_forward_ref(
        x, c_init, h_init, w_o, b_o, w_c, w_r, b_r,
        tau_h=tau_h, alpha_x=alpha_x, alpha_h=alpha_h, alpha_hp=alpha_hp,
        matmul_dtype=jnp.bfloat16)
    assert jnp.allclose(errors, ref_bf16, atol=1e-2, rtol=1e-2), "mismatch vs bf16 reference"

    # Full-f32 reference (loose check that bf16 operands did not change semantics).
    ref_f32 = pc_rnn_forward_ref(
        x, c_init, h_init, w_o, b_o, w_c, w_r, b_r,
        tau_h=tau_h, alpha_x=alpha_x, alpha_h=alpha_h, alpha_hp=alpha_hp,
        matmul_dtype=jnp.float32)
    assert jnp.allclose(errors, ref_f32, atol=5e-2, rtol=5e-2), "mismatch vs f32 reference"

    print("KERNEL_OK")
</pallas_src>

<mosaic_0001>
module attributes {stable_mosaic.version = 11 : i64} {
  func.func @kernel(%arg0: i32, %arg1: i32, %arg2: memref<8x8x16xf32, #tpu.memory_space<vmem>>, %arg3: memref<8x32xf32, #tpu.memory_space<vmem>>, %arg4: memref<8x8xf32, #tpu.memory_space<vmem>>, %arg5: memref<8x32xbf16, #tpu.memory_space<vmem>>, %arg6: memref<32x32xbf16, #tpu.memory_space<vmem>>, %arg7: memref<32x16xbf16, #tpu.memory_space<vmem>>, %arg8: memref<16x32xbf16, #tpu.memory_space<vmem>>, %arg9: memref<32x8xbf16, #tpu.memory_space<vmem>>, %arg10: memref<1x32xf32, #tpu.memory_space<vmem>>, %arg11: memref<1x16xf32, #tpu.memory_space<vmem>>, %arg12: memref<8x128xf32, #tpu.memory_space<vmem>>, %arg13: memref<8x32xf32, #tpu.memory_space<vmem>>, %arg14: memref<8x32xf32, #tpu.memory_space<vmem>>, %arg15: memref<8x8xf32, #tpu.memory_space<vmem>>) attributes {dimension_semantics = [#tpu.dimension_semantics<parallel>, #tpu.dimension_semantics<arbitrary>], iteration_bounds = array<i64: 1, 1>, scalar_prefetch = 0 : i64, scratch_operands = 3 : i64, tpu.core_type = #tpu.core_type<tc>, window_params = [{transform_indices = @transform_0, window_bounds = array<i64: 8, 8, 16>}, {transform_indices = @transform_1, window_bounds = array<i64: 8, 32>}, {transform_indices = @transform_2, window_bounds = array<i64: 8, 8>}, {pipeline_mode = #tpu.pipeline_mode<synchronous>, transform_indices = @transform_3, window_bounds = array<i64: 8, 32>}, {pipeline_mode = #tpu.pipeline_mode<synchronous>, transform_indices = @transform_4, window_bounds = array<i64: 32, 32>}, {pipeline_mode = #tpu.pipeline_mode<synchronous>, transform_indices = @transform_5, window_bounds = array<i64: 32, 16>}, {pipeline_mode = #tpu.pipeline_mode<synchronous>, transform_indices = @transform_6, window_bounds = array<i64: 16, 32>}, {pipeline_mode = #tpu.pipeline_mode<synchronous>, transform_indices = @transform_7, window_bounds = array<i64: 32, 8>}, {pipeline_mode = #tpu.pipeline_mode<synchronous>, transform_indices = @transform_8, window_bounds = array<i64: 1, 32>}, {pipeline_mode = #tpu.pipeline_mode<synchronous>, transform_indices = @transform_9, window_bounds = array<i64: 1, 16>}, {transform_indices = @transform_10, window_bounds = array<i64: 8, 128>}]} {
    %c0_i32 = arith.constant 0 : i32
    %0 = arith.cmpi eq, %arg1, %c0_i32 : i32
    %1 = arith.extui %0 : i1 to i32
    %c0_i32_0 = arith.constant 0 : i32
    %2 = arith.cmpi ne, %1, %c0_i32_0 : i32
    scf.if %2 {
      %c0_139 = arith.constant 0 : index
      %c0_140 = arith.constant 0 : index
      %348 = vector.load %arg3[%c0_139, %c0_140] : memref<8x32xf32, #tpu.memory_space<vmem>>, vector<8x32xf32>
      %c0_141 = arith.constant 0 : index
      %c0_142 = arith.constant 0 : index
      %349 = vector.load %arg13[%c0_141, %c0_142] : memref<8x32xf32, #tpu.memory_space<vmem>>, vector<8x32xf32>
      tpu.vector_store %arg13[%c0_141, %c0_142], %348 {strides = array<i32>} : memref<8x32xf32, #tpu.memory_space<vmem>>, vector<8x32xf32>,
      %cst_143 = arith.constant 0.000000e+00 : f32
      %350 = vector.broadcast %cst_143 : f32 to vector<8x32xf32>
      %c0_144 = arith.constant 0 : index
      %c0_145 = arith.constant 0 : index
      %351 = vector.load %arg14[%c0_144, %c0_145] : memref<8x32xf32, #tpu.memory_space<vmem>>, vector<8x32xf32>
      tpu.vector_store %arg14[%c0_144, %c0_145], %350 {strides = array<i32>} : memref<8x32xf32, #tpu.memory_space<vmem>>, vector<8x32xf32>,
      %c0_146 = arith.constant 0 : index
      %c0_147 = arith.constant 0 : index
      %352 = vector.load %arg4[%c0_146, %c0_147] : memref<8x8xf32, #tpu.memory_space<vmem>>, vector<8x8xf32>
      %c0_148 = arith.constant 0 : index
      %c0_149 = arith.constant 0 : index
      %353 = vector.load %arg15[%c0_148, %c0_149] : memref<8x8xf32, #tpu.memory_space<vmem>>, vector<8x8xf32>
      tpu.vector_store %arg15[%c0_148, %c0_149], %352 {strides = array<i32>} : memref<8x8xf32, #tpu.memory_space<vmem>>, vector<8x8xf32>,
    } else {
    }
    %c0 = arith.constant 0 : index
    %c0_1 = arith.constant 0 : index
    %3 = vector.load %arg5[%c0, %c0_1] : memref<8x32xbf16, #tpu.memory_space<vmem>>, vector<8x32xbf16>
    %c0_2 = arith.constant 0 : index
    %c0_3 = arith.constant 0 : index
    %4 = vector.load %arg6[%c0_2, %c0_3] : memref<32x32xbf16, #tpu.memory_space<vmem>>, vector<32x32xbf16>
    %c0_4 = arith.constant 0 : index
    %c0_5 = arith.constant 0 : index
    %5 = vector.load %arg7[%c0_4, %c0_5] : memref<32x16xbf16, #tpu.memory_space<vmem>>, vector<32x16xbf16>
    %c0_6 = arith.constant 0 : index
    %c0_7 = arith.constant 0 : index
    %6 = vector.load %arg10[%c0_6, %c0_7] : memref<1x32xf32, #tpu.memory_space<vmem>>, vector<1x32xf32>
    %7 = vector.shape_cast %6 : vector<1x32xf32> to vector<1x32xf32>
    %8 = vector.broadcast %7 : vector<1x32xf32> to vector<8x32xf32>
    %c0_8 = arith.constant 0 : index
    %c0_9 = arith.constant 0 : index
    %9 = vector.load %arg11[%c0_8, %c0_9] : memref<1x16xf32, #tpu.memory_space<vmem>>, vector<1x16xf32>
    %10 = vector.shape_cast %9 : vector<1x16xf32> to vector<1x16xf32>
    %11 = vector.broadcast %10 : vector<1x16xf32> to vector<8x16xf32>
    %c0_10 = arith.constant 0 : index
    %c0_11 = arith.constant 0 : index
    %12 = vector.load %arg8[%c0_10, %c0_11] : memref<16x32xbf16, #tpu.memory_space<vmem>>, vector<16x32xbf16>
    %c0_12 = arith.constant 0 : index
    %c0_13 = arith.constant 0 : index
    %13 = vector.load %arg9[%c0_12, %c0_13] : memref<32x8xbf16, #tpu.memory_space<vmem>>, vector<32x8xbf16>
    %c0_14 = arith.constant 0 : index
    %c0_15 = arith.constant 0 : index
    %14 = vector.load %arg13[%c0_14, %c0_15] : memref<8x32xf32, #tpu.memory_space<vmem>>, vector<8x32xf32>
    %c0_16 = arith.constant 0 : index
    %c0_17 = arith.constant 0 : index
    %15 = vector.load %arg14[%c0_16, %c0_17] : memref<8x32xf32, #tpu.memory_space<vmem>>, vector<8x32xf32>
    %c0_18 = arith.constant 0 : index
    %c0_19 = arith.constant 0 : index
    %16 = vector.load %arg15[%c0_18, %c0_19] : memref<8x8xf32, #tpu.memory_space<vmem>>, vector<8x8xf32>
    %17 = arith.truncf %16 : vector<8x8xf32> to vector<8x8xbf16>
    %cst = arith.constant dense<0.000000e+00> : vector<8x32xf32>
    %18 = tpu.matmul %17, %3, %cst {dimension_numbers = #tpu.dot_dimension_numbers<[1], [0], [0], [1], [0, 0, 1, 1], [], []>} : vector<8x8xbf16>, vector<8x32xbf16>, vector<8x32xf32> -> vector<8x32xf32>
    %19 = math.tanh %14 : vector<8x32xf32>
    %20 = arith.truncf %19 : vector<8x32xf32> to vector<8x32xbf16>
    %cst_20 = arith.constant dense<0.000000e+00> : vector<8x32xf32>
    %21 = tpu.matmul %20, %4, %cst_20 {dimension_numbers = #tpu.dot_dimension_numbers<[1], [0], [0], [1], [0, 0, 1, 1], [], []>} : vector<8x32xbf16>, vector<32x32xbf16>, vector<8x32xf32> -> vector<8x32xf32>
    %22 = arith.addf %18, %21 : vector<8x32xf32>
    %cst_21 = arith.constant 5.000000e-01 : f32
    %23 = vector.broadcast %cst_21 : f32 to vector<8x32xf32>
    %24 = arith.mulf %23, %15 : vector<8x32xf32>
    %25 = arith.addf %22, %8 : vector<8x32xf32>
    %26 = arith.subf %25, %14 : vector<8x32xf32>
    %cst_22 = arith.constant 5.000000e-01 : f32
    %27 = vector.broadcast %cst_22 : f32 to vector<8x32xf32>
    %28 = arith.mulf %27, %26 : vector<8x32xf32>
    %29 = arith.addf %24, %28 : vector<8x32xf32>
    %30 = arith.addf %14, %29 : vector<8x32xf32>
    %31 = math.tanh %30 : vector<8x32xf32>
    %32 = arith.truncf %31 : vector<8x32xf32> to vector<8x32xbf16>
    %cst_23 = arith.constant dense<0.000000e+00> : vector<8x16xf32>
    %33 = tpu.matmul %32, %5, %cst_23 {dimension_numbers = #tpu.dot_dimension_numbers<[1], [0], [0], [1], [0, 0, 1, 1], [], []>} : vector<8x32xbf16>, vector<32x16xbf16>, vector<8x16xf32> -> vector<8x16xf32>
    %34 = arith.addf %33, %11 : vector<8x16xf32>
    %c0_24 = arith.constant 0 : index
    %c0_25 = arith.constant 0 : index
    %c0_26 = arith.constant 0 : index
    %35 = vector.load %arg2[%c0_24, %c0_25, %c0_26] : memref<8x8x16xf32, #tpu.memory_space<vmem>>, vector<1x8x16xf32>
    %36 = vector.shape_cast %35 : vector<1x8x16xf32> to vector<8x16xf32>
    %37 = arith.subf %34, %36 : vector<8x16xf32>
    %c0_27 = arith.constant 0 : index
    %c0_28 = arith.constant 0 : index
    %38 = vector.load %arg12[%c0_27, %c0_28] : memref<8x128xf32, #tpu.memory_space<vmem>>, vector<8x16xf32>
    tpu.vector_store %arg12[%c0_27, %c0_28], %37 {strides = array<i32>} : memref<8x128xf32, #tpu.memory_space<vmem>>, vector<8x16xf32>,
    %39 = arith.truncf %37 : vector<8x16xf32> to vector<8x16xbf16>
    %cst_29 = arith.constant dense<0.000000e+00> : vector<8x32xf32>
    %40 = tpu.matmul %39, %12, %cst_29 {dimension_numbers = #tpu.dot_dimension_numbers<[1], [0], [0], [1], [0, 0, 1, 1], [], []>} : vector<8x16xbf16>, vector<16x32xbf16>, vector<8x32xf32> -> vector<8x32xf32>
    %41 = arith.mulf %31, %31 : vector<8x32xf32>
    %cst_30 = arith.constant 1.000000e+00 : f32
    %42 = vector.broadcast %cst_30 : f32 to vector<8x32xf32>
    %43 = arith.subf %42, %41 : vector<8x32xf32>
    %cst_31 = arith.constant 1.000000e-01 : f32
    %44 = vector.broadcast %cst_31 : f32 to vector<8x32xf32>
    %45 = arith.mulf %44, %43 : vector<8x32xf32>
    %46 = arith.mulf %45, %40 : vector<8x32xf32>
    %47 = arith.subf %30, %46 : vector<8x32xf32>
    %48 = arith.subf %30, %47 : vector<8x32xf32>
    %cst_32 = arith.constant 1.000000e-01 : f32
    %49 = vector.broadcast %cst_32 : f32 to vector<8x32xf32>
    %50 = arith.mulf %49, %48 : vector<8x32xf32>
    %51 = arith.subf %29, %50 : vector<8x32xf32>
    %52 = arith.subf %29, %51 : vector<8x32xf32>
    %53 = arith.truncf %52 : vector<8x32xf32> to vector<8x32xbf16>
    %cst_33 = arith.constant dense<0.000000e+00> : vector<8x8xf32>
    %54 = tpu.matmul %53, %13, %cst_33 {dimension_numbers = #tpu.dot_dimension_numbers<[1], [0], [0], [1], [0, 0, 1, 1], [], []>} : vector<8x32xbf16>, vector<32x8xbf16>, vector<8x8xf32> -> vector<8x8xf32>
    %cst_34 = arith.constant 0.00999999977 : f32
    %55 = vector.broadcast %cst_34 : f32 to vector<8x8xf32>
    %56 = arith.mulf %55, %54 : vector<8x8xf32>
    %57 = arith.subf %16, %56 : vector<8x8xf32>
    %58 = arith.truncf %57 : vector<8x8xf32> to vector<8x8xbf16>
    %cst_35 = arith.constant dense<0.000000e+00> : vector<8x32xf32>
    %59 = tpu.matmul %58, %3, %cst_35 {dimension_numbers = #tpu.dot_dimension_numbers<[1], [0], [0], [1], [0, 0, 1, 1], [], []>} : vector<8x8xbf16>, vector<8x32xbf16>, vector<8x32xf32> -> vector<8x32xf32>
    %60 = math.tanh %47 : vector<8x32xf32>
    %61 = arith.truncf %60 : vector<8x32xf32> to vector<8x32xbf16>
    %cst_36 = arith.constant dense<0.000000e+00> : vector<8x32xf32>
    %62 = tpu.matmul %61, %4, %cst_36 {dimension_numbers = #tpu.dot_dimension_numbers<[1], [0], [0], [1], [0, 0, 1, 1], [], []>} : vector<8x32xbf16>, vector<32x32xbf16>, vector<8x32xf32> -> vector<8x32xf32>
    %63 = arith.addf %59, %62 : vector<8x32xf32>
    %cst_37 = arith.constant 5.000000e-01 : f32
    %64 = vector.broadcast %cst_37 : f32 to vector<8x32xf32>
    %65 = arith.mulf %64, %51 : vector<8x32xf32>
    %66 = arith.addf %63, %8 : vector<8x32xf32>
    %67 = arith.subf %66, %47 : vector<8x32xf32>
    %cst_38 = arith.constant 5.000000e-01 : f32
    %68 = vector.broadcast %cst_38 : f32 to vector<8x32xf32>
    %69 = arith.mulf %68, %67 : vector<8x32xf32>
    %70 = arith.addf %65, %69 : vector<8x32xf32>
    %71 = arith.addf %47, %70 : vector<8x32xf32>
    %72 = math.tanh %71 : vector<8x32xf32>
    %73 = arith.truncf %72 : vector<8x32xf32> to vector<8x32xbf16>
    %cst_39 = arith.constant dense<0.000000e+00> : vector<8x16xf32>
    %74 = tpu.matmul %73, %5, %cst_39 {dimension_numbers = #tpu.dot_dimension_numbers<[1], [0], [0], [1], [0, 0, 1, 1], [], []>} : vector<8x32xbf16>, vector<32x16xbf16>, vector<8x16xf32> -> vector<8x16xf32>
    %75 = arith.addf %74, %11 : vector<8x16xf32>
    %c1 = arith.constant 1 : index
    %c0_40 = arith.constant 0 : index
    %c0_41 = arith.constant 0 : index
    %76 = vector.load %arg2[%c1, %c0_40, %c0_41] : memref<8x8x16xf32, #tpu.memory_space<vmem>>, vector<1x8x16xf32>
    %77 = vector.shape_cast %76 : vector<1x8x16xf32> to vector<8x16xf32>
    %78 = arith.subf %75, %77 : vector<8x16xf32>
    %c0_42 = arith.constant 0 : index
    %c16 = arith.constant 16 : index
    %79 = vector.load %arg12[%c0_42, %c16] : memref<8x128xf32, #tpu.memory_space<vmem>>, vector<8x16xf32>
    tpu.vector_store %arg12[%c0_42, %c16], %78 {strides = array<i32>} : memref<8x128xf32, #tpu.memory_space<vmem>>, vector<8x16xf32>,
    %80 = arith.truncf %78 : vector<8x16xf32> to vector<8x16xbf16>
    %cst_43 = arith.constant dense<0.000000e+00> : vector<8x32xf32>
    %81 = tpu.matmul %80, %12, %cst_43 {dimension_numbers = #tpu.dot_dimension_numbers<[1], [0], [0], [1], [0, 0, 1, 1], [], []>} : vector<8x16xbf16>, vector<16x32xbf16>, vector<8x32xf32> -> vector<8x32xf32>
    %82 = arith.mulf %72, %72 : vector<8x32xf32>
    %cst_44 = arith.constant 1.000000e+00 : f32
    %83 = vector.broadcast %cst_44 : f32 to vector<8x32xf32>
    %84 = arith.subf %83, %82 : vector<8x32xf32>
    %cst_45 = arith.constant 1.000000e-01 : f32
    %85 = vector.broadcast %cst_45 : f32 to vector<8x32xf32>
    %86 = arith.mulf %85, %84 : vector<8x32xf32>
    %87 = arith.mulf %86, %81 : vector<8x32xf32>
    %88 = arith.subf %71, %87 : vector<8x32xf32>
    %89 = arith.subf %71, %88 : vector<8x32xf32>
    %cst_46 = arith.constant 1.000000e-01 : f32
    %90 = vector.broadcast %cst_46 : f32 to vector<8x32xf32>
    %91 = arith.mulf %90, %89 : vector<8x32xf32>
    %92 = arith.subf %70, %91 : vector<8x32xf32>
    %93 = arith.subf %70, %92 : vector<8x32xf32>
    %94 = arith.truncf %93 : vector<8x32xf32> to vector<8x32xbf16>
    %cst_47 = arith.constant dense<0.000000e+00> : vector<8x8xf32>
    %95 = tpu.matmul %94, %13, %cst_47 {dimension_numbers = #tpu.dot_dimension_numbers<[1], [0], [0], [1], [0, 0, 1, 1], [], []>} : vector<8x32xbf16>, vector<32x8xbf16>, vector<8x8xf32> -> vector<8x8xf32>
    %cst_48 = arith.constant 0.00999999977 : f32
    %96 = vector.broadcast %cst_48 : f32 to vector<8x8xf32>
    %97 = arith.mulf %96, %95 : vector<8x8xf32>
    %98 = arith.subf %57, %97 : vector<8x8xf32>
    %99 = arith.truncf %98 : vector<8x8xf32> to vector<8x8xbf16>
    %cst_49 = arith.constant dense<0.000000e+00> : vector<8x32xf32>
    %100 = tpu.matmul %99, %3, %cst_49 {dimension_numbers = #tpu.dot_dimension_numbers<[1], [0], [0], [1], [0, 0, 1, 1], [], []>} : vector<8x8xbf16>, vector<8x32xbf16>, vector<8x32xf32> -> vector<8x32xf32>
    %101 = math.tanh %88 : vector<8x32xf32>
    %102 = arith.truncf %101 : vector<8x32xf32> to vector<8x32xbf16>
    %cst_50 = arith.constant dense<0.000000e+00> : vector<8x32xf32>
    %103 = tpu.matmul %102, %4, %cst_50 {dimension_numbers = #tpu.dot_dimension_numbers<[1], [0], [0], [1], [0, 0, 1, 1], [], []>} : vector<8x32xbf16>, vector<32x32xbf16>, vector<8x32xf32> -> vector<8x32xf32>
    %104 = arith.addf %100, %103 : vector<8x32xf32>
    %cst_51 = arith.constant 5.000000e-01 : f32
    %105 = vector.broadcast %cst_51 : f32 to vector<8x32xf32>
    %106 = arith.mulf %105, %92 : vector<8x32xf32>
    %107 = arith.addf %104, %8 : vector<8x32xf32>
    %108 = arith.subf %107, %88 : vector<8x32xf32>
    %cst_52 = arith.constant 5.000000e-01 : f32
    %109 = vector.broadcast %cst_52 : f32 to vector<8x32xf32>
    %110 = arith.mulf %109, %108 : vector<8x32xf32>
    %111 = arith.addf %106, %110 : vector<8x32xf32>
    %112 = arith.addf %88, %111 : vector<8x32xf32>
    %113 = math.tanh %112 : vector<8x32xf32>
    %114 = arith.truncf %113 : vector<8x32xf32> to vector<8x32xbf16>
    %cst_53 = arith.constant dense<0.000000e+00> : vector<8x16xf32>
    %115 = tpu.matmul %114, %5, %cst_53 {dimension_numbers = #tpu.dot_dimension_numbers<[1], [0], [0], [1], [0, 0, 1, 1], [], []>} : vector<8x32xbf16>, vector<32x16xbf16>, vector<8x16xf32> -> vector<8x16xf32>
    %116 = arith.addf %115, %11 : vector<8x16xf32>
    %c2 = arith.constant 2 : index
    %c0_54 = arith.constant 0 : index
    %c0_55 = arith.constant 0 : index
    %117 = vector.load %arg2[%c2, %c0_54, %c0_55] : memref<8x8x16xf32, #tpu.memory_space<vmem>>, vector<1x8x16xf32>
    %118 = vector.shape_cast %117 : vector<1x8x16xf32> to vector<8x16xf32>
    %119 = arith.subf %116, %118 : vector<8x16xf32>
    %c0_56 = arith.constant 0 : index
    %c32 = arith.constant 32 : index
    %120 = vector.load %arg12[%c0_56, %c32] : memref<8x128xf32, #tpu.memory_space<vmem>>, vector<8x16xf32>
    tpu.vector_store %arg12[%c0_56, %c32], %119 {strides = array<i32>} : memref<8x128xf32, #tpu.memory_space<vmem>>, vector<8x16xf32>,
    %121 = arith.truncf %119 : vector<8x16xf32> to vector<8x16xbf16>
    %cst_57 = arith.constant dense<0.000000e+00> : vector<8x32xf32>
    %122 = tpu.matmul %121, %12, %cst_57 {dimension_numbers = #tpu.dot_dimension_numbers<[1], [0], [0], [1], [0, 0, 1, 1], [], []>} : vector<8x16xbf16>, vector<16x32xbf16>, vector<8x32xf32> -> vector<8x32xf32>
    %123 = arith.mulf %113, %113 : vector<8x32xf32>
    %cst_58 = arith.constant 1.000000e+00 : f32
    %124 = vector.broadcast %cst_58 : f32 to vector<8x32xf32>
    %125 = arith.subf %124, %123 : vector<8x32xf32>
    %cst_59 = arith.constant 1.000000e-01 : f32
    %126 = vector.broadcast %cst_59 : f32 to vector<8x32xf32>
    %127 = arith.mulf %126, %125 : vector<8x32xf32>
    %128 = arith.mulf %127, %122 : vector<8x32xf32>
    %129 = arith.subf %112, %128 : vector<8x32xf32>
    %130 = arith.subf %112, %129 : vector<8x32xf32>
    %cst_60 = arith.constant 1.000000e-01 : f32
    %131 = vector.broadcast %cst_60 : f32 to vector<8x32xf32>
    %132 = arith.mulf %131, %130 : vector<8x32xf32>
    %133 = arith.subf %111, %132 : vector<8x32xf32>
    %134 = arith.subf %111, %133 : vector<8x32xf32>
    %135 = arith.truncf %134 : vector<8x32xf32> to vector<8x32xbf16>
    %cst_61 = arith.constant dense<0.000000e+00> : vector<8x8xf32>
    %136 = tpu.matmul %135, %13, %cst_61 {dimension_numbers = #tpu.dot_dimension_numbers<[1], [0], [0], [1], [0, 0, 1, 1], [], []>} : vector<8x32xbf16>, vector<32x8xbf16>, vector<8x8xf32> -> vector<8x8xf32>
    %cst_62 = arith.constant 0.00999999977 : f32
    %137 = vector.broadcast %cst_62 : f32 to vector<8x8xf32>
    %138 = arith.mulf %137, %136 : vector<8x8xf32>
    %139 = arith.subf %98, %138 : vector<8x8xf32>
    %140 = arith.truncf %139 : vector<8x8xf32> to vector<8x8xbf16>
    %cst_63 = arith.constant dense<0.000000e+00> : vector<8x32xf32>
    %141 = tpu.matmul %140, %3, %cst_63 {dimension_numbers = #tpu.dot_dimension_numbers<[1], [0], [0], [1], [0, 0, 1, 1], [], []>} : vector<8x8xbf16>, vector<8x32xbf16>, vector<8x32xf32> -> vector<8x32xf32>
    %142 = math.tanh %129 : vector<8x32xf32>
    %143 = arith.truncf %142 : vector<8x32xf32> to vector<8x32xbf16>
    %cst_64 = arith.constant dense<0.000000e+00> : vector<8x32xf32>
    %144 = tpu.matmul %143, %4, %cst_64 {dimension_numbers = #tpu.dot_dimension_numbers<[1], [0], [0], [1], [0, 0, 1, 1], [], []>} : vector<8x32xbf16>, vector<32x32xbf16>, vector<8x32xf32> -> vector<8x32xf32>
    %145 = arith.addf %141, %144 : vector<8x32xf32>
    %cst_65 = arith.constant 5.000000e-01 : f32
    %146 = vector.broadcast %cst_65 : f32 to vector<8x32xf32>
    %147 = arith.mulf %146, %133 : vector<8x32xf32>
    %148 = arith.addf %145, %8 : vector<8x32xf32>
    %149 = arith.subf %148, %129 : vector<8x32xf32>
    %cst_66 = arith.constant 5.000000e-01 : f32
    %150 = vector.broadcast %cst_66 : f32 to vector<8x32xf32>
    %151 = arith.mulf %150, %149 : vector<8x32xf32>
    %152 = arith.addf %147, %151 : vector<8x32xf32>
    %153 = arith.addf %129, %152 : vector<8x32xf32>
    %154 = math.tanh %153 : vector<8x32xf32>
    %155 = arith.truncf %154 : vector<8x32xf32> to vector<8x32xbf16>
    %cst_67 = arith.constant dense<0.000000e+00> : vector<8x16xf32>
    %156 = tpu.matmul %155, %5, %cst_67 {dimension_numbers = #tpu.dot_dimension_numbers<[1], [0], [0], [1], [0, 0, 1, 1], [], []>} : vector<8x32xbf16>, vector<32x16xbf16>, vector<8x16xf32> -> vector<8x16xf32>
    %157 = arith.addf %156, %11 : vector<8x16xf32>
    %c3 = arith.constant 3 : index
    %c0_68 = arith.constant 0 : index
    %c0_69 = arith.constant 0 : index
    %158 = vector.load %arg2[%c3, %c0_68, %c0_69] : memref<8x8x16xf32, #tpu.memory_space<vmem>>, vector<1x8x16xf32>
    %159 = vector.shape_cast %158 : vector<1x8x16xf32> to vector<8x16xf32>
    %160 = arith.subf %157, %159 : vector<8x16xf32>
    %c0_70 = arith.constant 0 : index
    %c48 = arith.constant 48 : index
    %161 = vector.load %arg12[%c0_70, %c48] : memref<8x128xf32, #tpu.memory_space<vmem>>, vector<8x16xf32>
    tpu.vector_store %arg12[%c0_70, %c48], %160 {strides = array<i32>} : memref<8x128xf32, #tpu.memory_space<vmem>>, vector<8x16xf32>,
    %162 = arith.truncf %160 : vector<8x16xf32> to vector<8x16xbf16>
    %cst_71 = arith.constant dense<0.000000e+00> : vector<8x32xf32>
    %163 = tpu.matmul %162, %12, %cst_71 {dimension_numbers = #tpu.dot_dimension_numbers<[1], [0], [0], [1], [0, 0, 1, 1], [], []>} : vector<8x16xbf16>, vector<16x32xbf16>, vector<8x32xf32> -> vector<8x32xf32>
    %164 = arith.mulf %154, %154 : vector<8x32xf32>
    %cst_72 = arith.constant 1.000000e+00 : f32
    %165 = vector.broadcast %cst_72 : f32 to vector<8x32xf32>
    %166 = arith.subf %165, %164 : vector<8x32xf32>
    %cst_73 = arith.constant 1.000000e-01 : f32
    %167 = vector.broadcast %cst_73 : f32 to vector<8x32xf32>
    %168 = arith.mulf %167, %166 : vector<8x32xf32>
    %169 = arith.mulf %168, %163 : vector<8x32xf32>
    %170 = arith.subf %153, %169 : vector<8x32xf32>
    %171 = arith.subf %153, %170 : vector<8x32xf32>
    %cst_74 = arith.constant 1.000000e-01 : f32
    %172 = vector.broadcast %cst_74 : f32 to vector<8x32xf32>
    %173 = arith.mulf %172, %171 : vector<8x32xf32>
    %174 = arith.subf %152, %173 : vector<8x32xf32>
    %175 = arith.subf %152, %174 : vector<8x32xf32>
    %176 = arith.truncf %175 : vector<8x32xf32> to vector<8x32xbf16>
    %cst_75 = arith.constant dense<0.000000e+00> : vector<8x8xf32>
    %177 = tpu.matmul %176, %13, %cst_75 {dimension_numbers = #tpu.dot_dimension_numbers<[1], [0], [0], [1], [0, 0, 1, 1], [], []>} : vector<8x32xbf16>, vector<32x8xbf16>, vector<8x8xf32> -> vector<8x8xf32>
    %cst_76 = arith.constant 0.00999999977 : f32
    %178 = vector.broadcast %cst_76 : f32 to vector<8x8xf32>
    %179 = arith.mulf %178, %177 : vector<8x8xf32>
    %180 = arith.subf %139, %179 : vector<8x8xf32>
    %181 = arith.truncf %180 : vector<8x8xf32> to vector<8x8xbf16>
    %cst_77 = arith.constant dense<0.000000e+00> : vector<8x32xf32>
    %182 = tpu.matmul %181, %3, %cst_77 {dimension_numbers = #tpu.dot_dimension_numbers<[1], [0], [0], [1], [0, 0, 1, 1], [], []>} : vector<8x8xbf16>, vector<8x32xbf16>, vector<8x32xf32> -> vector<8x32xf32>
    %183 = math.tanh %170 : vector<8x32xf32>
    %184 = arith.truncf %183 : vector<8x32xf32> to vector<8x32xbf16>
    %cst_78 = arith.constant dense<0.000000e+00> : vector<8x32xf32>
    %185 = tpu.matmul %184, %4, %cst_78 {dimension_numbers = #tpu.dot_dimension_numbers<[1], [0], [0], [1], [0, 0, 1, 1], [], []>} : vector<8x32xbf16>, vector<32x32xbf16>, vector<8x32xf32> -> vector<8x32xf32>
    %186 = arith.addf %182, %185 : vector<8x32xf32>
    %cst_79 = arith.constant 5.000000e-01 : f32
    %187 = vector.broadcast %cst_79 : f32 to vector<8x32xf32>
    %188 = arith.mulf %187, %174 : vector<8x32xf32>
    %189 = arith.addf %186, %8 : vector<8x32xf32>
    %190 = arith.subf %189, %170 : vector<8x32xf32>
    %cst_80 = arith.constant 5.000000e-01 : f32
    %191 = vector.broadcast %cst_80 : f32 to vector<8x32xf32>
    %192 = arith.mulf %191, %190 : vector<8x32xf32>
    %193 = arith.addf %188, %192 : vector<8x32xf32>
    %194 = arith.addf %170, %193 : vector<8x32xf32>
    %195 = math.tanh %194 : vector<8x32xf32>
    %196 = arith.truncf %195 : vector<8x32xf32> to vector<8x32xbf16>
    %cst_81 = arith.constant dense<0.000000e+00> : vector<8x16xf32>
    %197 = tpu.matmul %196, %5, %cst_81 {dimension_numbers = #tpu.dot_dimension_numbers<[1], [0], [0], [1], [0, 0, 1, 1], [], []>} : vector<8x32xbf16>, vector<32x16xbf16>, vector<8x16xf32> -> vector<8x16xf32>
    %198 = arith.addf %197, %11 : vector<8x16xf32>
    %c4 = arith.constant 4 : index
    %c0_82 = arith.constant 0 : index
    %c0_83 = arith.constant 0 : index
    %199 = vector.load %arg2[%c4, %c0_82, %c0_83] : memref<8x8x16xf32, #tpu.memory_space<vmem>>, vector<1x8x16xf32>
    %200 = vector.shape_cast %199 : vector<1x8x16xf32> to vector<8x16xf32>
    %201 = arith.subf %198, %200 : vector<8x16xf32>
    %c0_84 = arith.constant 0 : index
    %c64 = arith.constant 64 : index
    %202 = vector.load %arg12[%c0_84, %c64] : memref<8x128xf32, #tpu.memory_space<vmem>>, vector<8x16xf32>
    tpu.vector_store %arg12[%c0_84, %c64], %201 {strides = array<i32>} : memref<8x128xf32, #tpu.memory_space<vmem>>, vector<8x16xf32>,
    %203 = arith.truncf %201 : vector<8x16xf32> to vector<8x16xbf16>
    %cst_85 = arith.constant dense<0.000000e+00> : vector<8x32xf32>
    %204 = tpu.matmul %203, %12, %cst_85 {dimension_numbers = #tpu.dot_dimension_numbers<[1], [0], [0], [1], [0, 0, 1, 1], [], []>} : vector<8x16xbf16>, vector<16x32xbf16>, vector<8x32xf32> -> vector<8x32xf32>
    %205 = arith.mulf %195, %195 : vector<8x32xf32>
    %cst_86 = arith.constant 1.000000e+00 : f32
    %206 = vector.broadcast %cst_86 : f32 to vector<8x32xf32>
    %207 = arith.subf %206, %205 : vector<8x32xf32>
    %cst_87 = arith.constant 1.000000e-01 : f32
    %208 = vector.broadcast %cst_87 : f32 to vector<8x32xf32>
    %209 = arith.mulf %208, %207 : vector<8x32xf32>
    %210 = arith.mulf %209, %204 : vector<8x32xf32>
    %211 = arith.subf %194, %210 : vector<8x32xf32>
    %212 = arith.subf %194, %211 : vector<8x32xf32>
    %cst_88 = arith.constant 1.000000e-01 : f32
    %213 = vector.broadcast %cst_88 : f32 to vector<8x32xf32>
    %214 = arith.mulf %213, %212 : vector<8x32xf32>
    %215 = arith.subf %193, %214 : vector<8x32xf32>
    %216 = arith.subf %193, %215 : vector<8x32xf32>
    %217 = arith.truncf %216 : vector<8x32xf32> to vector<8x32xbf16>
    %cst_89 = arith.constant dense<0.000000e+00> : vector<8x8xf32>
    %218 = tpu.matmul %217, %13, %cst_89 {dimension_numbers = #tpu.dot_dimension_numbers<[1], [0], [0], [1], [0, 0, 1, 1], [], []>} : vector<8x32xbf16>, vector<32x8xbf16>, vector<8x8xf32> -> vector<8x8xf32>
    %cst_90 = arith.constant 0.00999999977 : f32
    %219 = vector.broadcast %cst_90 : f32 to vector<8x8xf32>
    %220 = arith.mulf %219, %218 : vector<8x8xf32>
    %221 = arith.subf %180, %220 : vector<8x8xf32>
    %222 = arith.truncf %221 : vector<8x8xf32> to vector<8x8xbf16>
    %cst_91 = arith.constant dense<0.000000e+00> : vector<8x32xf32>
    %223 = tpu.matmul %222, %3, %cst_91 {dimension_numbers = #tpu.dot_dimension_numbers<[1], [0], [0], [1], [0, 0, 1, 1], [], []>} : vector<8x8xbf16>, vector<8x32xbf16>, vector<8x32xf32> -> vector<8x32xf32>
    %224 = math.tanh %211 : vector<8x32xf32>
    %225 = arith.truncf %224 : vector<8x32xf32> to vector<8x32xbf16>
    %cst_92 = arith.constant dense<0.000000e+00> : vector<8x32xf32>
    %226 = tpu.matmul %225, %4, %cst_92 {dimension_numbers = #tpu.dot_dimension_numbers<[1], [0], [0], [1], [0, 0, 1, 1], [], []>} : vector<8x32xbf16>, vector<32x32xbf16>, vector<8x32xf32> -> vector<8x32xf32>
    %227 = arith.addf %223, %226 : vector<8x32xf32>
    %cst_93 = arith.constant 5.000000e-01 : f32
    %228 = vector.broadcast %cst_93 : f32 to vector<8x32xf32>
    %229 = arith.mulf %228, %215 : vector<8x32xf32>
    %230 = arith.addf %227, %8 : vector<8x32xf32>
    %231 = arith.subf %230, %211 : vector<8x32xf32>
    %cst_94 = arith.constant 5.000000e-01 : f32
    %232 = vector.broadcast %cst_94 : f32 to vector<8x32xf32>
    %233 = arith.mulf %232, %231 : vector<8x32xf32>
    %234 = arith.addf %229, %233 : vector<8x32xf32>
    %235 = arith.addf %211, %234 : vector<8x32xf32>
    %236 = math.tanh %235 : vector<8x32xf32>
    %237 = arith.truncf %236 : vector<8x32xf32> to vector<8x32xbf16>
    %cst_95 = arith.constant dense<0.000000e+00> : vector<8x16xf32>
    %238 = tpu.matmul %237, %5, %cst_95 {dimension_numbers = #tpu.dot_dimension_numbers<[1], [0], [0], [1], [0, 0, 1, 1], [], []>} : vector<8x32xbf16>, vector<32x16xbf16>, vector<8x16xf32> -> vector<8x16xf32>
    %239 = arith.addf %238, %11 : vector<8x16xf32>
    %c5 = arith.constant 5 : index
    %c0_96 = arith.constant 0 : index
    %c0_97 = arith.constant 0 : index
    %240 = vector.load %arg2[%c5, %c0_96, %c0_97] : memref<8x8x16xf32, #tpu.memory_space<vmem>>, vector<1x8x16xf32>
    %241 = vector.shape_cast %240 : vector<1x8x16xf32> to vector<8x16xf32>
    %242 = arith.subf %239, %241 : vector<8x16xf32>
    %c0_98 = arith.constant 0 : index
    %c80 = arith.constant 80 : index
    %243 = vector.load %arg12[%c0_98, %c80] : memref<8x128xf32, #tpu.memory_space<vmem>>, vector<8x16xf32>
    tpu.vector_store %arg12[%c0_98, %c80], %242 {strides = array<i32>} : memref<8x128xf32, #tpu.memory_space<vmem>>, vector<8x16xf32>,
    %244 = arith.truncf %242 : vector<8x16xf32> to vector<8x16xbf16>
    %cst_99 = arith.constant dense<0.000000e+00> : vector<8x32xf32>
    %245 = tpu.matmul %244, %12, %cst_99 {dimension_numbers = #tpu.dot_dimension_numbers<[1], [0], [0], [1], [0, 0, 1, 1], [], []>} : vector<8x16xbf16>, vector<16x32xbf16>, vector<8x32xf32> -> vector<8x32xf32>
    %246 = arith.mulf %236, %236 : vector<8x32xf32>
    %cst_100 = arith.constant 1.000000e+00 : f32
    %247 = vector.broadcast %cst_100 : f32 to vector<8x32xf32>
    %248 = arith.subf %247, %246 : vector<8x32xf32>
    %cst_101 = arith.constant 1.000000e-01 : f32
    %249 = vector.broadcast %cst_101 : f32 to vector<8x32xf32>
    %250 = arith.mulf %249, %248 : vector<8x32xf32>
    %251 = arith.mulf %250, %245 : vector<8x32xf32>
    %252 = arith.subf %235, %251 : vector<8x32xf32>
    %253 = arith.subf %235, %252 : vector<8x32xf32>
    %cst_102 = arith.constant 1.000000e-01 : f32
    %254 = vector.broadcast %cst_102 : f32 to vector<8x32xf32>
    %255 = arith.mulf %254, %253 : vector<8x32xf32>
    %256 = arith.subf %234, %255 : vector<8x32xf32>
    %257 = arith.subf %234, %256 : vector<8x32xf32>
    %258 = arith.truncf %257 : vector<8x32xf32> to vector<8x32xbf16>
    %cst_103 = arith.constant dense<0.000000e+00> : vector<8x8xf32>
    %259 = tpu.matmul %258, %13, %cst_103 {dimension_numbers = #tpu.dot_dimension_numbers<[1], [0], [0], [1], [0, 0, 1, 1], [], []>} : vector<8x32xbf16>, vector<32x8xbf16>, vector<8x8xf32> -> vector<8x8xf32>
    %cst_104 = arith.constant 0.00999999977 : f32
    %260 = vector.broadcast %cst_104 : f32 to vector<8x8xf32>
    %261 = arith.mulf %260, %259 : vector<8x8xf32>
    %262 = arith.subf %221, %261 : vector<8x8xf32>
    %263 = arith.truncf %262 : vector<8x8xf32> to vector<8x8xbf16>
    %cst_105 = arith.constant dense<0.000000e+00> : vector<8x32xf32>
    %264 = tpu.matmul %263, %3, %cst_105 {dimension_numbers = #tpu.dot_dimension_numbers<[1], [0], [0], [1], [0, 0, 1, 1], [], []>} : vector<8x8xbf16>, vector<8x32xbf16>, vector<8x32xf32> -> vector<8x32xf32>
    %265 = math.tanh %252 : vector<8x32xf32>
    %266 = arith.truncf %265 : vector<8x32xf32> to vector<8x32xbf16>
    %cst_106 = arith.constant dense<0.000000e+00> : vector<8x32xf32>
    %267 = tpu.matmul %266, %4, %cst_106 {dimension_numbers = #tpu.dot_dimension_numbers<[1], [0], [0], [1], [0, 0, 1, 1], [], []>} : vector<8x32xbf16>, vector<32x32xbf16>, vector<8x32xf32> -> vector<8x32xf32>
    %268 = arith.addf %264, %267 : vector<8x32xf32>
    %cst_107 = arith.constant 5.000000e-01 : f32
    %269 = vector.broadcast %cst_107 : f32 to vector<8x32xf32>
    %270 = arith.mulf %269, %256 : vector<8x32xf32>
    %271 = arith.addf %268, %8 : vector<8x32xf32>
    %272 = arith.subf %271, %252 : vector<8x32xf32>
    %cst_108 = arith.constant 5.000000e-01 : f32
    %273 = vector.broadcast %cst_108 : f32 to vector<8x32xf32>
    %274 = arith.mulf %273, %272 : vector<8x32xf32>
    %275 = arith.addf %270, %274 : vector<8x32xf32>
    %276 = arith.addf %252, %275 : vector<8x32xf32>
    %277 = math.tanh %276 : vector<8x32xf32>
    %278 = arith.truncf %277 : vector<8x32xf32> to vector<8x32xbf16>
    %cst_109 = arith.constant dense<0.000000e+00> : vector<8x16xf32>
    %279 = tpu.matmul %278, %5, %cst_109 {dimension_numbers = #tpu.dot_dimension_numbers<[1], [0], [0], [1], [0, 0, 1, 1], [], []>} : vector<8x32xbf16>, vector<32x16xbf16>, vector<8x16xf32> -> vector<8x16xf32>
    %280 = arith.addf %279, %11 : vector<8x16xf32>
    %c6 = arith.constant 6 : index
    %c0_110 = arith.constant 0 : index
    %c0_111 = arith.constant 0 : index
    %281 = vector.load %arg2[%c6, %c0_110, %c0_111] : memref<8x8x16xf32, #tpu.memory_space<vmem>>, vector<1x8x16xf32>
    %282 = vector.shape_cast %281 : vector<1x8x16xf32> to vector<8x16xf32>
    %283 = arith.subf %280, %282 : vector<8x16xf32>
    %c0_112 = arith.constant 0 : index
    %c96 = arith.constant 96 : index
    %284 = vector.load %arg12[%c0_112, %c96] : memref<8x128xf32, #tpu.memory_space<vmem>>, vector<8x16xf32>
    tpu.vector_store %arg12[%c0_112, %c96], %283 {strides = array<i32>} : memref<8x128xf32, #tpu.memory_space<vmem>>, vector<8x16xf32>,
    %285 = arith.truncf %283 : vector<8x16xf32> to vector<8x16xbf16>
    %cst_113 = arith.constant dense<0.000000e+00> : vector<8x32xf32>
    %286 = tpu.matmul %285, %12, %cst_113 {dimension_numbers = #tpu.dot_dimension_numbers<[1], [0], [0], [1], [0, 0, 1, 1], [], []>} : vector<8x16xbf16>, vector<16x32xbf16>, vector<8x32xf32> -> vector<8x32xf32>
    %287 = arith.mulf %277, %277 : vector<8x32xf32>
    %cst_114 = arith.constant 1.000000e+00 : f32
    %288 = vector.broadcast %cst_114 : f32 to vector<8x32xf32>
    %289 = arith.subf %288, %287 : vector<8x32xf32>
    %cst_115 = arith.constant 1.000000e-01 : f32
    %290 = vector.broadcast %cst_115 : f32 to vector<8x32xf32>
    %291 = arith.mulf %290, %289 : vector<8x32xf32>
    %292 = arith.mulf %291, %286 : vector<8x32xf32>
    %293 = arith.subf %276, %292 : vector<8x32xf32>
    %294 = arith.subf %276, %293 : vector<8x32xf32>
    %cst_116 = arith.constant 1.000000e-01 : f32
    %295 = vector.broadcast %cst_116 : f32 to vector<8x32xf32>
    %296 = arith.mulf %295, %294 : vector<8x32xf32>
    %297 = arith.subf %275, %296 : vector<8x32xf32>
    %298 = arith.subf %275, %297 : vector<8x32xf32>
    %299 = arith.truncf %298 : vector<8x32xf32> to vector<8x32xbf16>
    %cst_117 = arith.constant dense<0.000000e+00> : vector<8x8xf32>
    %300 = tpu.matmul %299, %13, %cst_117 {dimension_numbers = #tpu.dot_dimension_numbers<[1], [0], [0], [1], [0, 0, 1, 1], [], []>} : vector<8x32xbf16>, vector<32x8xbf16>, vector<8x8xf32> -> vector<8x8xf32>
    %cst_118 = arith.constant 0.00999999977 : f32
    %301 = vector.broadcast %cst_118 : f32 to vector<8x8xf32>
    %302 = arith.mulf %301, %300 : vector<8x8xf32>
    %303 = arith.subf %262, %302 : vector<8x8xf32>
    %304 = arith.truncf %303 : vector<8x8xf32> to vector<8x8xbf16>
    %cst_119 = arith.constant dense<0.000000e+00> : vector<8x32xf32>
    %305 = tpu.matmul %304, %3, %cst_119 {dimension_numbers = #tpu.dot_dimension_numbers<[1], [0], [0], [1], [0, 0, 1, 1], [], []>} : vector<8x8xbf16>, vector<8x32xbf16>, vector<8x32xf32> -> vector<8x32xf32>
    %306 = math.tanh %293 : vector<8x32xf32>
    %307 = arith.truncf %306 : vector<8x32xf32> to vector<8x32xbf16>
    %cst_120 = arith.constant dense<0.000000e+00> : vector<8x32xf32>
    %308 = tpu.matmul %307, %4, %cst_120 {dimension_numbers = #tpu.dot_dimension_numbers<[1], [0], [0], [1], [0, 0, 1, 1], [], []>} : vector<8x32xbf16>, vector<32x32xbf16>, vector<8x32xf32> -> vector<8x32xf32>
    %309 = arith.addf %305, %308 : vector<8x32xf32>
    %cst_121 = arith.constant 5.000000e-01 : f32
    %310 = vector.broadcast %cst_121 : f32 to vector<8x32xf32>
    %311 = arith.mulf %310, %297 : vector<8x32xf32>
    %312 = arith.addf %309, %8 : vector<8x32xf32>
    %313 = arith.subf %312, %293 : vector<8x32xf32>
    %cst_122 = arith.constant 5.000000e-01 : f32
    %314 = vector.broadcast %cst_122 : f32 to vector<8x32xf32>
    %315 = arith.mulf %314, %313 : vector<8x32xf32>
    %316 = arith.addf %311, %315 : vector<8x32xf32>
    %317 = arith.addf %293, %316 : vector<8x32xf32>
    %318 = math.tanh %317 : vector<8x32xf32>
    %319 = arith.truncf %318 : vector<8x32xf32> to vector<8x32xbf16>
    %cst_123 = arith.constant dense<0.000000e+00> : vector<8x16xf32>
    %320 = tpu.matmul %319, %5, %cst_123 {dimension_numbers = #tpu.dot_dimension_numbers<[1], [0], [0], [1], [0, 0, 1, 1], [], []>} : vector<8x32xbf16>, vector<32x16xbf16>, vector<8x16xf32> -> vector<8x16xf32>
    %321 = arith.addf %320, %11 : vector<8x16xf32>
    %c7 = arith.constant 7 : index
    %c0_124 = arith.constant 0 : index
    %c0_125 = arith.constant 0 : index
    %322 = vector.load %arg2[%c7, %c0_124, %c0_125] : memref<8x8x16xf32, #tpu.memory_space<vmem>>, vector<1x8x16xf32>
    %323 = vector.shape_cast %322 : vector<1x8x16xf32> to vector<8x16xf32>
    %324 = arith.subf %321, %323 : vector<8x16xf32>
    %c0_126 = arith.constant 0 : index
    %c112 = arith.constant 112 : index
    %325 = vector.load %arg12[%c0_126, %c112] : memref<8x128xf32, #tpu.memory_space<vmem>>, vector<8x16xf32>
    tpu.vector_store %arg12[%c0_126, %c112], %324 {strides = array<i32>} : memref<8x128xf32, #tpu.memory_space<vmem>>, vector<8x16xf32>,
    %326 = arith.truncf %324 : vector<8x16xf32> to vector<8x16xbf16>
    %cst_127 = arith.constant dense<0.000000e+00> : vector<8x32xf32>
    %327 = tpu.matmul %326, %12, %cst_127 {dimension_numbers = #tpu.dot_dimension_numbers<[1], [0], [0], [1], [0, 0, 1, 1], [], []>} : vector<8x16xbf16>, vector<16x32xbf16>, vector<8x32xf32> -> vector<8x32xf32>
    %328 = arith.mulf %318, %318 : vector<8x32xf32>
    %cst_128 = arith.constant 1.000000e+00 : f32
    %329 = vector.broadcast %cst_128 : f32 to vector<8x32xf32>
    %330 = arith.subf %329, %328 : vector<8x32xf32>
    %cst_129 = arith.constant 1.000000e-01 : f32
    %331 = vector.broadcast %cst_129 : f32 to vector<8x32xf32>
    %332 = arith.mulf %331, %330 : vector<8x32xf32>
    %333 = arith.mulf %332, %327 : vector<8x32xf32>
    %334 = arith.subf %317, %333 : vector<8x32xf32>
    %335 = arith.subf %317, %334 : vector<8x32xf32>
    %cst_130 = arith.constant 1.000000e-01 : f32
    %336 = vector.broadcast %cst_130 : f32 to vector<8x32xf32>
    %337 = arith.mulf %336, %335 : vector<8x32xf32>
    %338 = arith.subf %316, %337 : vector<8x32xf32>
    %339 = arith.subf %316, %338 : vector<8x32xf32>
    %340 = arith.truncf %339 : vector<8x32xf32> to vector<8x32xbf16>
    %cst_131 = arith.constant dense<0.000000e+00> : vector<8x8xf32>
    %341 = tpu.matmul %340, %13, %cst_131 {dimension_numbers = #tpu.dot_dimension_numbers<[1], [0], [0], [1], [0, 0, 1, 1], [], []>} : vector<8x32xbf16>, vector<32x8xbf16>, vector<8x8xf32> -> vector<8x8xf32>
    %cst_132 = arith.constant 0.00999999977 : f32
    %342 = vector.broadcast %cst_132 : f32 to vector<8x8xf32>
    %343 = arith.mulf %342, %341 : vector<8x8xf32>
    %344 = arith.subf %303, %343 : vector<8x8xf32>
    %c0_133 = arith.constant 0 : index
    %c0_134 = arith.constant 0 : index
    %345 = vector.load %arg13[%c0_133, %c0_134] : memref<8x32xf32, #tpu.memory_space<vmem>>, vector<8x32xf32>
    tpu.vector_store %arg13[%c0_133, %c0_134], %334 {strides = array<i32>} : memref<8x32xf32, #tpu.memory_space<vmem>>, vector<8x32xf32>,
    %c0_135 = arith.constant 0 : index
    %c0_136 = arith.constant 0 : index
    %346 = vector.load %arg14[%c0_135, %c0_136] : memref<8x32xf32, #tpu.memory_space<vmem>>, vector<8x32xf32>
    tpu.vector_store %arg14[%c0_135, %c0_136], %338 {strides = array<i32>} : memref<8x32xf32, #tpu.memory_space<vmem>>, vector<8x32xf32>,
    %c0_137 = arith.constant 0 : index
    %c0_138 = arith.constant 0 : index
    %347 = vector.load %arg15[%c0_137, %c0_138] : memref<8x8xf32, #tpu.memory_space<vmem>>, vector<8x8xf32>
    tpu.vector_store %arg15[%c0_137, %c0_138], %344 {strides = array<i32>} : memref<8x8xf32, #tpu.memory_space<vmem>>, vector<8x8xf32>,
    return
  }
  func.func @transform_0(%arg0: i32, %arg1: i32) -> (i32, i32, i32) {
    %c0_i32 = arith.constant 0 : i32
    %c0_i32_0 = arith.constant 0 : i32
    return %arg1, %arg0, %c0_i32 : i32, i32, i32
  }
  func.func @transform_1(%arg0: i32, %arg1: i32) -> (i32, i32) {
    %c0_i32 = arith.constant 0 : i32
    %c0_i32_0 = arith.constant 0 : i32
    return %arg0, %c0_i32 : i32, i32
  }
  func.func @transform_2(%arg0: i32, %arg1: i32) -> (i32, i32) {
    %c0_i32 = arith.constant 0 : i32
    %c0_i32_0 = arith.constant 0 : i32
    return %arg0, %c0_i32 : i32, i32
  }
  func.func @transform_3(%arg0: i32, %arg1: i32) -> (i32, i32) {
    %c0_i32 = arith.constant 0 : i32
    %c0_i32_0 = arith.constant 0 : i32
    %c0_i32_1 = arith.constant 0 : i32
    return %c0_i32, %c0_i32_0 : i32, i32
  }
  func.func @transform_4(%arg0: i32, %arg1: i32) -> (i32, i32) {
    %c0_i32 = arith.constant 0 : i32
    %c0_i32_0 = arith.constant 0 : i32
    %c0_i32_1 = arith.constant 0 : i32
    return %c0_i32, %c0_i32_0 : i32, i32
  }
  func.func @transform_5(%arg0: i32, %arg1: i32) -> (i32, i32) {
    %c0_i32 = arith.constant 0 : i32
    %c0_i32_0 = arith.constant 0 : i32
    %c0_i32_1 = arith.constant 0 : i32
    return %c0_i32, %c0_i32_0 : i32, i32
  }
  func.func @transform_6(%arg0: i32, %arg1: i32) -> (i32, i32) {
    %c0_i32 = arith.constant 0 : i32
    %c0_i32_0 = arith.constant 0 : i32
    %c0_i32_1 = arith.constant 0 : i32
    return %c0_i32, %c0_i32_0 : i32, i32
  }
  func.func @transform_7(%arg0: i32, %arg1: i32) -> (i32, i32) {
    %c0_i32 = arith.constant 0 : i32
    %c0_i32_0 = arith.constant 0 : i32
    %c0_i32_1 = arith.constant 0 : i32
    return %c0_i32, %c0_i32_0 : i32, i32
  }
  func.func @transform_8(%arg0: i32, %arg1: i32) -> (i32, i32) {
    %c0_i32 = arith.constant 0 : i32
    %c0_i32_0 = arith.constant 0 : i32
    %c0_i32_1 = arith.constant 0 : i32
    return %c0_i32, %c0_i32_0 : i32, i32
  }
  func.func @transform_9(%arg0: i32, %arg1: i32) -> (i32, i32) {
    %c0_i32 = arith.constant 0 : i32
    %c0_i32_0 = arith.constant 0 : i32
    %c0_i32_1 = arith.constant 0 : i32
    return %c0_i32, %c0_i32_0 : i32, i32
  }
  func.func @transform_10(%arg0: i32, %arg1: i32) -> (i32, i32) {
    %c0_i32 = arith.constant 0 : i32
    return %arg0, %arg1 : i32, i32
  }
}

</mosaic_0001>

<bundles_post_ra>
// kernel: pc_rnn_forward.1
= control target key start
LH: loop header
LB: loop body
LE: loop exit
PB: predicated region body
PF: predicated region fallthrough
CT: control target
= control target key end

     0   :  { %vm109_vm0 = vcmask 1043456   ;;  %vm45_vm1 = vcmask 64512   ;;  %vm41_vm2 = vcmask 261120   ;;  %v1151_v11 = vmov 0.0   ;;  %s1152_s14 = smov 16   ;;  %s1153_s19 = smov 32   ;;  %s1450_s3 = inlined_call_operand.vmem [shape: bf16[8,32], index: 3, kind: input, shape index: {}]   ;;  %s1451_s4 = inlined_call_operand.vmem [shape: bf16[32,32], index: 4, kind: input, shape index: {}]   ;;  %s1452_s2 = inlined_call_operand.vmem [shape: f32[8,8], index: 2, kind: input, shape index: {}]   ;;  %s1453_s1 = inlined_call_operand.vmem [shape: f32[8,32], index: 1, kind: input, shape index: {}]   ;;  %s1454_s8 = inlined_call_operand.vmem [shape: f32[1,32], index: 8, kind: input, shape index: {}]   ;;  %s1455_s9 = inlined_call_operand.vmem [shape: f32[1,16], index: 9, kind: input, shape index: {}]   ;;  %s1456_s5 = inlined_call_operand.vmem [shape: bf16[32,16], index: 5, kind: input, shape index: {}]   ;;  %s1457_s6 = inlined_call_operand.vmem [shape: bf16[16,32], index: 6, kind: input, shape index: {}]   ;;  %s1458_s7 = inlined_call_operand.vmem [shape: bf16[32,8], index: 7, kind: input, shape index: {}]   ;;  %s1459_s0 = inlined_call_operand.vmem [shape: f32[8,8,16], index: 0, kind: input, shape index: {}]   ;;  %s1460_s10 = inlined_call_operand.vmem [shape: f32[8,128], index: 10, kind: output, shape index: {}]  }
   0x1   :  { %v47_v0 = vld [vmem:[%s1450_s3] sm:$0xf]  ;;  %v1220_v1 = vld [vmem:[%s1451_s4 + $0x8] sm:$0xff]  ;;  %43 = vst.msk [vmem:[#allocation3] sm:$0xff] %vm41_vm2, %v1151_v11  ;;  %vm164_vm3 = vcmask 130048   ;;  %vm295_vm4 = vcmask 261248  }
   0x2   :  { %v44_v2 = vld [vmem:[%s1452_s2] sm:$0xff]  ;;  %v1225_v3 = vsel %vm109_vm0, %v47_v0, 0  ;;  %98 = vmatpush.bf16.msra.mxu0 %v1220_v1  ;;  %v1253_v12 = vld [vmem:[%s1456_s5 + $0x8] sm:$0xff]  ;;  %vm408_vm5 = vcmask 392448   ;;  %s1154_s2 = smov 48   ;;  %vm521_vm6 = vcmask 523648  }
   0x3   :  { %46 = vst.msk [vmem:[#allocation4] sm:$0xff] %vm45_vm1, %v44_v2  ;;  %v40_v4 = vld [vmem:[%s1453_s1] sm:$0xff]  ;;  %120 = vmatpush.bf16.msra.mxu1 %v1225_v3  ;;  %155 = vmatpush.bf16.msra.mxu2 %v1253_v12  ;;  %v1282_v30 = vld [vmem:[%s1458_s7 + $0x8] sm:$0xff]  ;;  %vm634_vm7 = vcmask 654848   ;;  %s1156_s28 = smov 80   ;;  %vm747_vm8 = vcmask 786048  }
   0x4   :  { %v1236_v5 = vld [vmem:[%s1451_s4] sm:$0xff]  ;;  %42 = vst.msk [vmem:[#allocation2] sm:$0xff] %vm41_vm2, %v40_v4  ;;  %v1063_v11 = vld [vmem:[%s1459_s0 + $0x8] sm:$0xff]  ;;  %vm860_vm9 = vcmask 917248   ;;  %s1158_s15 = smov 112   ;;  %vm973_vm10 = vcmask 1048448  }
   0x5   :  { %v1259_v13 = vld [vmem:[%s1456_s5] sm:$0xff]  ;;  %s1155_s5 = smov 64  }
   0x6   :  { %99 = vmatpush.bf16.msra.mxu0 %v1236_v5  ;;  %v1267_v15 = vld [vmem:[%s1454_s8] ss:$0 sm:$0xff] }
   0x7   :  { %156 = vmatpush.bf16.msra.mxu2 %v1259_v13  ;;  %v1275_v29 = vld [vmem:[%s1457_s6] sm:$0xff]  ;;  %220 = vmatpush.bf16.msrb.mxu1 %v1282_v30 }
   0x8   :  { %v71_v19 = vld [vmem:[#allocation3] sm:$0xff]  ;;  %183 = vmatpush.bf16.msra.mxu3 %v1275_v29  ;;  %v1289_v31 = vld [vmem:[%s1455_s9] ss:$0 sm:$0xff]  ;;  %s1157_s9 = smov 96  }
   0x9   :  { %v126_v21 = vmul.f32 0.5, %v71_v19  ;;  %v162_v33 = vld [vmem:[%s1459_s0] sm:$0xff] }
   0xa   :  { %258 = vmatpush.bf16.msrb.mxu0 %v1225_v3  ;;  %v1241_v6 = vld [vmem:[#allocation4] sm:$0xff]  ;;  %v1304_v38 = vld [vmem:[%s1458_s7] sm:$0xff] }
   0xb   :  { %v73_v7 = vpack.c.bf16 %v1241_v6, %v1241_v6  ;;  %v70_v8 = vld [vmem:[#allocation2] sm:$0xff]  ;;  %281 = vmatpush.bf16.msrb.mxu2 %v1253_v12  ;;  %221 = vmatpush.bf16.msrb.mxu1 %v1304_v38 }
   0xc   :  { %1119 = vtanh.f32 %v70_v8  ;;  %241 = vmatpush.bf16.msrb.mxu3 %v1220_v1 }
   0xd   :  { %1036 = vmatmul.msk.bf16.vlgmr.msra.gmra.mxu1 %vm45_vm1, %v73_v7 }
   0xf   :  { %282 = vmatpush.bf16.msrb.mxu2 %v1259_v13  ;;  %308 = vmatpush.bf16.msra.mxu1 %v1275_v29 }
  0x10   :  { %242 = vmatpush.bf16.msrb.mxu3 %v1236_v5 }
  0x12   :  { %v1120_v9 = vpop.eup %1119 }
  0x13   :  { %v75_v10 = vpack.c.bf16 %v1120_v9, %v1120_v9 }
  0x15   :  { %1035 = vmatmul.msk.bf16.vlgmr.msra.gmra.mxu0 %vm41_vm2, %v75_v10 }
  0x16   :  { %354 = vmatpush.bf16.msra.mxu0 %v1220_v1 }
  0x1a   :  { %355 = vmatpush.bf16.msra.mxu0 %v1236_v5 }
  0x8a   :  { %v122_v14 = vpop.f32.mrf.mxu1 }
  0x92   :  { %v101_v16 = vpop.f32.mrf.mxu0  ;;  %v124_v17 = vpop.f32.mrf.mxu1 }
  0x93   :  { %v123_v18 = vadd.f32 %v122_v14, %v101_v16 }
  0x95   :  { %v127_v20 = vadd.f32 %v1267_v15, %v123_v18 }
  0x97   :  { %v128_v22 = vsub.f32 %v127_v20, %v70_v8 }
  0x99   :  { %v129_v23 = vmul.f32 0.5, %v128_v22 }
  0x9a   :  { %v103_v24 = vpop.f32.mrf.mxu0 }
  0x9b   :  { %v130_v25 = vadd.f32 %v129_v23, %v126_v21 }
  0x9d   :  { %v131_v26 = vadd.f32 %v130_v25, %v70_v8 }
  0x9f   :  { %1121 = vtanh.f32 %v131_v26 }
  0xa5   :  { %v1122_v27 = vpop.eup %1121 }
  0xa6   :  { %v133_v28 = vpack.c.bf16 %v1122_v27, %v1122_v27  ;;  %v189_v39 = vmul.f32 %v1122_v27, %v1122_v27 }
  0xa8   :  { %1045 = vmatmul.msk.bf16.vlgmr.msra.gmra.mxu2 %vm41_vm2, %v133_v28  ;;  %v190_v40 = vsub.f32 1.0, %v189_v39 }
  0xa9   :  { %371 = vmatpush.bf16.msra.mxu2 %v1225_v3 }
  0xaa   :  { %v191_v41 = vmul.f32 0.1, %v190_v40 }
 0x12b   :  { %v158_v32 = vpop.f32.mrf.mxu2 }
 0x12c   :  { %v159_v34 = vadd.f32 %v1289_v31, %v158_v32 }
 0x12e   :  { %v163_v35 = vsub.f32 %v159_v34, %v162_v33 }
 0x130   :  { %165 = vst.msk [vmem:[%s1460_s10] sm:$0xff] %vm164_vm3, %v163_v35  ;;  %v166_v36 = vpack.c.bf16 %v163_v35, %v163_v35 }
 0x132   :  { %1050 = vmatmul.msk.bf16.vlgmr.msra.gmra.mxu3 %vm164_vm3, %v166_v36 }
 0x133   :  { %v160_v37 = vpop.f32.mrf.mxu2  ;;  %333 = vmatpush.bf16.msra.mxu3 %v1282_v30 }
 0x137   :  { %334 = vmatpush.bf16.msra.mxu3 %v1304_v38 }
 0x1b5   :  { %v185_v42 = vpop.f32.mrf.mxu3 }
 0x1b6   :  { %v192_v43 = vmul.f32 %v191_v41, %v185_v42 }
 0x1b8   :  { %v193_v44 = vsub.f32 %v131_v26, %v192_v43 }
 0x1ba   :  { %v194_v45 = vsub.f32 %v131_v26, %v193_v44  ;;  %1123 = vtanh.f32 %v193_v44 }
 0x1bc   :  { %v195_v46 = vmul.f32 0.1, %v194_v45 }
 0x1bd   :  { %v187_v47 = vpop.f32.mrf.mxu3 }
 0x1be   :  { %v196_v48 = vsub.f32 %v130_v25, %v195_v46 }
 0x1c0   :  { %v1124_v49 = vpop.eup %1123  ;;  %v197_v50 = vsub.f32 %v130_v25, %v196_v48  ;;  %v264_v0 = vmul.f32 0.5, %v196_v48 }
 0x1c1   :  { %v231_v51 = vpack.c.bf16 %v1124_v49, %v1124_v49 }
 0x1c2   :  { %v198_v52 = vpack.c.bf16 %v197_v50, %v197_v50 }
 0x1c3   :  { %1060 = vmatmul.msk.bf16.vlgmr.msrb.gmra.mxu3 %vm41_vm2, %v231_v51 }
 0x1c4   :  { %1059 = vmatmul.msk.bf16.vlgmr.msrb.gmra.mxu1 %vm41_vm2, %v198_v52  ;;  %421 = vmatpush.bf16.msrb.mxu3 %v1275_v29 }
 0x1c5   :  { %394 = vmatpush.bf16.msrb.mxu1 %v1253_v12 }
 0x1c9   :  { %395 = vmatpush.bf16.msrb.mxu1 %v1259_v13 }
 0x241   :  { %v223_v53 = vpop.f32.mrf.mxu1 }
 0x242   :  { %v227_v54 = vmul.f32 0.01, %v223_v53 }
 0x244   :  { %v228_v55 = vsub.f32 %v1241_v6, %v227_v54 }
 0x246   :  { %v229_v56 = vpack.c.bf16 %v228_v55, %v228_v55  ;;  %v244_v57 = vpop.f32.mrf.mxu3 }
 0x248   :  { %1061 = vmatmul.msk.bf16.vlgmr.msrb.gmra.mxu0 %vm45_vm1, %v229_v56 }
 0x249   :  { %v225_v58 = vpop.f32.mrf.mxu1  ;;  %446 = vmatpush.bf16.msrb.mxu0 %v1282_v30 }
 0x24d   :  { %447 = vmatpush.bf16.msrb.mxu0 %v1304_v38 }
 0x24e   :  { %v246_v59 = vpop.f32.mrf.mxu3 }
 0x2c5   :  { %v260_v60 = vpop.f32.mrf.mxu0 }
 0x2c6   :  { %v261_v61 = vadd.f32 %v260_v60, %v244_v57  ;;  %v1069_v57 = vld [vmem:[%s1459_s0 + $0x10] sm:$0xff] }
 0x2c8   :  { %v265_v62 = vadd.f32 %v1267_v15, %v261_v61 }
 0x2ca   :  { %v266_v63 = vsub.f32 %v265_v62, %v193_v44 }
 0x2cc   :  { %v267_v2 = vmul.f32 0.5, %v266_v63 }
 0x2cd   :  { %v262_v4 = vpop.f32.mrf.mxu0 }
 0x2ce   :  { %v268_v7 = vadd.f32 %v267_v2, %v264_v0 }
 0x2d0   :  { %v269_v6 = vadd.f32 %v268_v7, %v193_v44 }
 0x2d2   :  { %1125 = vtanh.f32 %v269_v6 }
 0x2d8   :  { %v1126_v8 = vpop.eup %1125 }
 0x2d9   :  { %v271_v9 = vpack.c.bf16 %v1126_v8, %v1126_v8  ;;  %v314_v20 = vmul.f32 %v1126_v8, %v1126_v8 }
 0x2db   :  { %1062 = vmatmul.msk.bf16.vlgmr.msrb.gmra.mxu2 %vm41_vm2, %v271_v9  ;;  %v315_v21 = vsub.f32 1.0, %v314_v20 }
 0x2dc   :  { %467 = vmatpush.bf16.msrb.mxu2 %v1220_v1 }
 0x2dd   :  { %v316_v22 = vmul.f32 0.1, %v315_v21 }
 0x2e0   :  { %468 = vmatpush.bf16.msrb.mxu2 %v1236_v5 }
 0x35e   :  { %v284_v10 = vpop.f32.mrf.mxu2 }
 0x35f   :  { %v285_v14 = vadd.f32 %v1289_v31, %v284_v10 }
 0x361   :  { %v290_v16 = vsub.f32 %v285_v14, %v1063_v11 }
 0x363   :  { %292 = vrot.lane.b32.xlu0 %v290_v16, %s1152_s14  ;;  %v297_v17 = vpack.c.bf16 %v290_v16, %v290_v16 }
 0x365   :  { %1064 = vmatmul.msk.bf16.vlgmr.msra.gmra.mxu1 %vm164_vm3, %v297_v17 }
 0x366   :  { %v286_v18 = vpop.f32.mrf.mxu2  ;;  %484 = vmatpush.bf16.msra.mxu1 %v1225_v3 }
 0x3d5   :  { %v293_v19 = vpop.permute.xlu0 %292 }
 0x3d6   :  { %296 = vst.msk [vmem:[%s1460_s10] sm:$0xff] %vm295_vm4, %v293_v19 }
 0x3e2   :  { %v310_v23 = vpop.f32.mrf.mxu1 }
 0x3e3   :  { %v317_v24 = vmul.f32 %v316_v22, %v310_v23 }
 0x3e5   :  { %v318_v25 = vsub.f32 %v269_v6, %v317_v24 }
 0x3e7   :  { %v319_v26 = vsub.f32 %v269_v6, %v318_v25  ;;  %1127 = vtanh.f32 %v318_v25 }
 0x3e9   :  { %v320_v27 = vmul.f32 0.1, %v319_v26 }
 0x3ea   :  { %v312_v28 = vpop.f32.mrf.mxu1 }
 0x3eb   :  { %v321_v32 = vsub.f32 %v268_v7, %v320_v27 }
 0x3ed   :  { %v1128_v33 = vpop.eup %1127  ;;  %v322_v34 = vsub.f32 %v268_v7, %v321_v32  ;;  %v377_v49 = vmul.f32 0.5, %v321_v32 }
 0x3ee   :  { %v344_v35 = vpack.c.bf16 %v1128_v33, %v1128_v33 }
 0x3ef   :  { %v323_v36 = vpack.c.bf16 %v322_v34, %v322_v34 }
 0x3f0   :  { %1066 = vmatmul.msk.bf16.vlgmr.msra.gmra.mxu0 %vm41_vm2, %v344_v35 }
 0x3f1   :  { %1065 = vmatmul.msk.bf16.vlgmr.msra.gmra.mxu3 %vm41_vm2, %v323_v36  ;;  %534 = vmatpush.bf16.msra.mxu0 %v1275_v29 }
 0x3f2   :  { %507 = vmatpush.bf16.msra.mxu3 %v1253_v12 }
 0x3f6   :  { %508 = vmatpush.bf16.msra.mxu3 %v1259_v13 }
 0x46d   :  { %v357_v37 = vpop.f32.mrf.mxu0 }
 0x474   :  { %v336_v39 = vpop.f32.mrf.mxu3 }
 0x475   :  { %v340_v40 = vmul.f32 0.01, %v336_v39  ;;  %v359_v41 = vpop.f32.mrf.mxu0 }
 0x477   :  { %v341_v42 = vsub.f32 %v228_v55, %v340_v40 }
 0x479   :  { %v342_v43 = vpack.c.bf16 %v341_v42, %v341_v42 }
 0x47b   :  { %1067 = vmatmul.msk.bf16.vlgmr.msra.gmra.mxu2 %vm45_vm1, %v342_v43 }
 0x47c   :  { %v338_v44 = vpop.f32.mrf.mxu3  ;;  %559 = vmatpush.bf16.msra.mxu2 %v1282_v30 }
 0x480   :  { %560 = vmatpush.bf16.msra.mxu2 %v1304_v38 }
 0x4fe   :  { %v373_v45 = vpop.f32.mrf.mxu2 }
 0x4ff   :  { %v374_v46 = vadd.f32 %v373_v45, %v357_v37 }
 0x501   :  { %v378_v47 = vadd.f32 %v1267_v15, %v374_v46 }
 0x503   :  { %v379_v48 = vsub.f32 %v378_v47, %v318_v25 }
 0x505   :  { %v380_v50 = vmul.f32 0.5, %v379_v48 }
 0x506   :  { %v375_v51 = vpop.f32.mrf.mxu2 }
 0x507   :  { %v381_v52 = vadd.f32 %v380_v50, %v377_v49 }
 0x509   :  { %v382_v53 = vadd.f32 %v381_v52, %v318_v25 }
 0x50b   :  { %1129 = vtanh.f32 %v382_v53 }
 0x511   :  { %v1130_v54 = vpop.eup %1129 }
 0x512   :  { %v384_v55 = vpack.c.bf16 %v1130_v54, %v1130_v54  ;;  %v427_v63 = vmul.f32 %v1130_v54, %v1130_v54 }
 0x514   :  { %1068 = vmatmul.msk.bf16.vlgmr.msrb.gmra.mxu1 %vm41_vm2, %v384_v55  ;;  %v428_v0 = vsub.f32 1.0, %v427_v63 }
 0x515   :  { %580 = vmatpush.bf16.msrb.mxu1 %v1220_v1 }
 0x516   :  { %v429_v2 = vmul.f32 0.1, %v428_v0 }
 0x519   :  { %581 = vmatpush.bf16.msrb.mxu1 %v1236_v5 }
 0x591   :  { %v397_v56 = vpop.f32.mrf.mxu1 }
 0x592   :  { %v398_v58 = vadd.f32 %v1289_v31, %v397_v56 }
 0x594   :  { %v403_v59 = vsub.f32 %v398_v58, %v1069_v57 }
 0x596   :  { %v410_v60 = vpack.c.bf16 %v403_v59, %v403_v59  ;;  %405 = vrot.lane.b32.xlu0 %v403_v59, %s1153_s19 }
 0x598   :  { %1070 = vmatmul.msk.bf16.vlgmr.msrb.gmra.mxu3 %vm164_vm3, %v410_v60 }
 0x599   :  { %v399_v61 = vpop.f32.mrf.mxu1  ;;  %597 = vmatpush.bf16.msrb.mxu3 %v1225_v3 }
 0x608   :  { %v406_v62 = vpop.permute.xlu0 %405 }
 0x609   :  { %409 = vst.msk [vmem:[%s1460_s10] sm:$0xff] %vm408_vm5, %v406_v62 }
 0x61b   :  { %v423_v4 = vpop.f32.mrf.mxu3 }
 0x61c   :  { %v430_v7 = vmul.f32 %v429_v2, %v423_v4 }
 0x61e   :  { %v431_v6 = vsub.f32 %v382_v53, %v430_v7 }
 0x620   :  { %v432_v8 = vsub.f32 %v382_v53, %v431_v6  ;;  %1131 = vtanh.f32 %v431_v6 }
 0x622   :  { %v433_v9 = vmul.f32 0.1, %v432_v8 }
 0x623   :  { %v425_v10 = vpop.f32.mrf.mxu3 }
 0x624   :  { %v434_v11 = vsub.f32 %v381_v52, %v433_v9 }
 0x626   :  { %v1132_v14 = vpop.eup %1131  ;;  %v435_v16 = vsub.f32 %v381_v52, %v434_v11  ;;  %v490_v33 = vmul.f32 0.5, %v434_v11 }
 0x627   :  { %v457_v17 = vpack.c.bf16 %v1132_v14, %v1132_v14 }
 0x628   :  { %v436_v18 = vpack.c.bf16 %v435_v16, %v435_v16 }
 0x629   :  { %1072 = vmatmul.msk.bf16.vlgmr.msrb.gmra.mxu2 %vm41_vm2, %v457_v17 }
 0x62a   :  { %1071 = vmatmul.msk.bf16.vlgmr.msrb.gmra.mxu0 %vm41_vm2, %v436_v18  ;;  %647 = vmatpush.bf16.msrb.mxu2 %v1275_v29 }
 0x62b   :  { %620 = vmatpush.bf16.msrb.mxu0 %v1253_v12 }
 0x62f   :  { %621 = vmatpush.bf16.msrb.mxu0 %v1259_v13 }
 0x6a7   :  { %v449_v19 = vpop.f32.mrf.mxu0 }
 0x6a8   :  { %v453_v20 = vmul.f32 0.01, %v449_v19 }
 0x6aa   :  { %v454_v21 = vsub.f32 %v341_v42, %v453_v20  ;;  %v1075_v42 = vld [vmem:[%s1459_s0 + $0x18] sm:$0xff] }
 0x6ac   :  { %v455_v22 = vpack.c.bf16 %v454_v21, %v454_v21  ;;  %v470_v23 = vpop.f32.mrf.mxu2 }
 0x6ae   :  { %1073 = vmatmul.msk.bf16.vlgmr.msra.gmra.mxu1 %vm45_vm1, %v455_v22 }
 0x6af   :  { %v451_v24 = vpop.f32.mrf.mxu0  ;;  %672 = vmatpush.bf16.msra.mxu1 %v1282_v30 }
 0x6b3   :  { %673 = vmatpush.bf16.msra.mxu1 %v1304_v38 }
 0x6b4   :  { %v472_v25 = vpop.f32.mrf.mxu2 }
 0x72b   :  { %v486_v26 = vpop.f32.mrf.mxu1 }
 0x72c   :  { %v487_v27 = vadd.f32 %v486_v26, %v470_v23  ;;  %v1081_v23 = vld [vmem:[%s1459_s0 + $0x20] sm:$0xff] }
 0x72e   :  { %v491_v28 = vadd.f32 %v1267_v15, %v487_v27 }
 0x730   :  { %v492_v32 = vsub.f32 %v491_v28, %v431_v6 }
 0x732   :  { %v493_v34 = vmul.f32 0.5, %v492_v32 }
 0x733   :  { %v488_v35 = vpop.f32.mrf.mxu1 }
 0x734   :  { %v494_v36 = vadd.f32 %v493_v34, %v490_v33 }
 0x736   :  { %v495_v37 = vadd.f32 %v494_v36, %v431_v6 }
 0x738   :  { %1133 = vtanh.f32 %v495_v37 }
 0x73e   :  { %v1134_v39 = vpop.eup %1133 }
 0x73f   :  { %v497_v40 = vpack.c.bf16 %v1134_v39, %v1134_v39  ;;  %v540_v48 = vmul.f32 %v1134_v39, %v1134_v39 }
 0x741   :  { %1074 = vmatmul.msk.bf16.vlgmr.msra.gmra.mxu3 %vm41_vm2, %v497_v40  ;;  %v541_v49 = vsub.f32 1.0, %v540_v48 }
 0x742   :  { %693 = vmatpush.bf16.msra.mxu3 %v1220_v1 }
 0x743   :  { %v542_v50 = vmul.f32 0.1, %v541_v49 }
 0x746   :  { %694 = vmatpush.bf16.msra.mxu3 %v1236_v5 }
 0x7c4   :  { %v510_v41 = vpop.f32.mrf.mxu3 }
 0x7c5   :  { %v511_v43 = vadd.f32 %v1289_v31, %v510_v41 }
 0x7c7   :  { %v516_v44 = vsub.f32 %v511_v43, %v1075_v42 }
 0x7c9   :  { %518 = vrot.lane.b32.xlu1 %v516_v44, %s1154_s2  ;;  %v523_v45 = vpack.c.bf16 %v516_v44, %v516_v44 }
 0x7cb   :  { %1076 = vmatmul.msk.bf16.vlgmr.msra.gmra.mxu0 %vm164_vm3, %v523_v45 }
 0x7cc   :  { %v512_v46 = vpop.f32.mrf.mxu3  ;;  %710 = vmatpush.bf16.msra.mxu0 %v1225_v3 }
 0x83b   :  { %v519_v47 = vpop.permute.xlu1 %518 }
 0x83c   :  { %522 = vst.msk [vmem:[%s1460_s10] sm:$0xff] %vm521_vm6, %v519_v47 }
 0x848   :  { %v536_v51 = vpop.f32.mrf.mxu0 }
 0x849   :  { %v543_v52 = vmul.f32 %v542_v50, %v536_v51 }
 0x84b   :  { %v544_v53 = vsub.f32 %v495_v37, %v543_v52 }
 0x84d   :  { %v545_v54 = vsub.f32 %v495_v37, %v544_v53  ;;  %1135 = vtanh.f32 %v544_v53 }
 0x84f   :  { %v546_v55 = vmul.f32 0.1, %v545_v54 }
 0x850   :  { %v538_v56 = vpop.f32.mrf.mxu0 }
 0x851   :  { %v547_v57 = vsub.f32 %v494_v36, %v546_v55 }
 0x853   :  { %v1136_v58 = vpop.eup %1135  ;;  %v548_v59 = vsub.f32 %v494_v36, %v547_v57  ;;  %v603_v14 = vmul.f32 0.5, %v547_v57 }
 0x854   :  { %v570_v60 = vpack.c.bf16 %v1136_v58, %v1136_v58 }
 0x855   :  { %v549_v61 = vpack.c.bf16 %v548_v59, %v548_v59 }
 0x856   :  { %1078 = vmatmul.msk.bf16.vlgmr.msrb.gmra.mxu1 %vm41_vm2, %v570_v60 }
 0x857   :  { %1077 = vmatmul.msk.bf16.vlgmr.msra.gmra.mxu2 %vm41_vm2, %v549_v61  ;;  %760 = vmatpush.bf16.msrb.mxu1 %v1275_v29 }
 0x858   :  { %733 = vmatpush.bf16.msra.mxu2 %v1253_v12 }
 0x85c   :  { %734 = vmatpush.bf16.msra.mxu2 %v1259_v13 }
 0x8d3   :  { %v583_v62 = vpop.f32.mrf.mxu1 }
 0x8da   :  { %v562_v63 = vpop.f32.mrf.mxu2 }
 0x8db   :  { %v566_v0 = vmul.f32 0.01, %v562_v63  ;;  %v585_v2 = vpop.f32.mrf.mxu1 }
 0x8dd   :  { %v567_v4 = vsub.f32 %v454_v21, %v566_v0 }
 0x8df   :  { %v568_v7 = vpack.c.bf16 %v567_v4, %v567_v4 }
 0x8e1   :  { %1079 = vmatmul.msk.bf16.vlgmr.msrb.gmra.mxu3 %vm45_vm1, %v568_v7 }
 0x8e2   :  { %v564_v6 = vpop.f32.mrf.mxu2  ;;  %785 = vmatpush.bf16.msrb.mxu3 %v1282_v30 }
 0x8e6   :  { %786 = vmatpush.bf16.msrb.mxu3 %v1304_v38 }
 0x964   :  { %v599_v8 = vpop.f32.mrf.mxu3 }
 0x965   :  { %v600_v9 = vadd.f32 %v599_v8, %v583_v62 }
 0x967   :  { %v604_v10 = vadd.f32 %v1267_v15, %v600_v9 }
 0x969   :  { %v605_v11 = vsub.f32 %v604_v10, %v544_v53 }
 0x96b   :  { %v606_v16 = vmul.f32 0.5, %v605_v11 }
 0x96c   :  { %v601_v17 = vpop.f32.mrf.mxu3 }
 0x96d   :  { %v607_v18 = vadd.f32 %v606_v16, %v603_v14 }
 0x96f   :  { %v608_v19 = vadd.f32 %v607_v18, %v544_v53 }
 0x971   :  { %1137 = vtanh.f32 %v608_v19 }
 0x977   :  { %v1138_v20 = vpop.eup %1137 }
 0x978   :  { %v610_v21 = vpack.c.bf16 %v1138_v20, %v1138_v20  ;;  %v653_v32 = vmul.f32 %v1138_v20, %v1138_v20 }
 0x97a   :  { %1080 = vmatmul.msk.bf16.vlgmr.msrb.gmra.mxu0 %vm41_vm2, %v610_v21  ;;  %v654_v33 = vsub.f32 1.0, %v653_v32 }
 0x97b   :  { %806 = vmatpush.bf16.msrb.mxu0 %v1220_v1 }
 0x97c   :  { %v655_v34 = vmul.f32 0.1, %v654_v33 }
 0x97f   :  { %807 = vmatpush.bf16.msrb.mxu0 %v1236_v5 }
 0x9f7   :  { %v623_v22 = vpop.f32.mrf.mxu0 }
 0x9f8   :  { %v624_v24 = vadd.f32 %v1289_v31, %v623_v22 }
 0x9fa   :  { %v629_v25 = vsub.f32 %v624_v24, %v1081_v23 }
 0x9fc   :  { %v636_v26 = vpack.c.bf16 %v629_v25, %v629_v25  ;;  %631 = vrot.lane.b32.xlu1 %v629_v25, %s1155_s5 }
 0x9fe   :  { %1082 = vmatmul.msk.bf16.vlgmr.msrb.gmra.mxu2 %vm164_vm3, %v636_v26 }
 0x9ff   :  { %v625_v27 = vpop.f32.mrf.mxu0  ;;  %823 = vmatpush.bf16.msrb.mxu2 %v1225_v3 }
 0xa6e   :  { %v632_v28 = vpop.permute.xlu1 %631 }
 0xa6f   :  { %635 = vst.msk [vmem:[%s1460_s10] sm:$0xff] %vm634_vm7, %v632_v28 }
 0xa81   :  { %v649_v35 = vpop.f32.mrf.mxu2 }
 0xa82   :  { %v656_v36 = vmul.f32 %v655_v34, %v649_v35 }
 0xa84   :  { %v657_v37 = vsub.f32 %v608_v19, %v656_v36 }
 0xa86   :  { %v658_v39 = vsub.f32 %v608_v19, %v657_v37  ;;  %1139 = vtanh.f32 %v657_v37 }
 0xa88   :  { %v659_v40 = vmul.f32 0.1, %v658_v39 }
 0xa89   :  { %v651_v41 = vpop.f32.mrf.mxu2 }
 0xa8a   :  { %v660_v42 = vsub.f32 %v607_v18, %v659_v40 }
 0xa8c   :  { %v1140_v43 = vpop.eup %1139  ;;  %v661_v44 = vsub.f32 %v607_v18, %v660_v42  ;;  %v716_v58 = vmul.f32 0.5, %v660_v42 }
 0xa8d   :  { %v683_v45 = vpack.c.bf16 %v1140_v43, %v1140_v43 }
 0xa8e   :  { %v662_v46 = vpack.c.bf16 %v661_v44, %v661_v44 }
 0xa8f   :  { %1084 = vmatmul.msk.bf16.vlgmr.msra.gmra.mxu3 %vm41_vm2, %v683_v45 }
 0xa90   :  { %1083 = vmatmul.msk.bf16.vlgmr.msra.gmra.mxu1 %vm41_vm2, %v662_v46  ;;  %873 = vmatpush.bf16.msra.mxu3 %v1275_v29 }
 0xa91   :  { %846 = vmatpush.bf16.msra.mxu1 %v1253_v12 }
 0xa95   :  { %847 = vmatpush.bf16.msra.mxu1 %v1259_v13 }
 0xb0d   :  { %v675_v47 = vpop.f32.mrf.mxu1 }
 0xb0e   :  { %v679_v48 = vmul.f32 0.01, %v675_v47 }
 0xb10   :  { %v680_v49 = vsub.f32 %v567_v4, %v679_v48  ;;  %v1087_v4 = vld [vmem:[%s1459_s0 + $0x28] sm:$0xff] }
 0xb12   :  { %v681_v50 = vpack.c.bf16 %v680_v49, %v680_v49  ;;  %v696_v51 = vpop.f32.mrf.mxu3 }
 0xb14   :  { %1085 = vmatmul.msk.bf16.vlgmr.msra.gmra.mxu0 %vm45_vm1, %v681_v50 }
 0xb15   :  { %v677_v52 = vpop.f32.mrf.mxu1  ;;  %898 = vmatpush.bf16.msra.mxu0 %v1282_v30 }
 0xb19   :  { %899 = vmatpush.bf16.msra.mxu0 %v1304_v38 }
 0xb1a   :  { %v698_v53 = vpop.f32.mrf.mxu3 }
 0xb91   :  { %v712_v54 = vpop.f32.mrf.mxu0 }
 0xb92   :  { %v713_v55 = vadd.f32 %v712_v54, %v696_v51 }
 0xb94   :  { %v717_v56 = vadd.f32 %v1267_v15, %v713_v55 }
 0xb96   :  { %v718_v57 = vsub.f32 %v717_v56, %v657_v37 }
 0xb98   :  { %v719_v59 = vmul.f32 0.5, %v718_v57 }
 0xb99   :  { %v714_v60 = vpop.f32.mrf.mxu0 }
 0xb9a   :  { %v720_v61 = vadd.f32 %v719_v59, %v716_v58 }
 0xb9c   :  { %v721_v62 = vadd.f32 %v720_v61, %v657_v37 }
 0xb9e   :  { %1141 = vtanh.f32 %v721_v62 }
 0xba4   :  { %v1142_v63 = vpop.eup %1141 }
 0xba5   :  { %v723_v0 = vpack.c.bf16 %v1142_v63, %v1142_v63 }
 0xba7   :  { %1086 = vmatmul.msk.bf16.vlgmr.msra.gmra.mxu2 %vm41_vm2, %v723_v0 }
 0xba8   :  { %919 = vmatpush.bf16.msra.mxu2 %v1220_v1 }
 0xbac   :  { %920 = vmatpush.bf16.msra.mxu2 %v1236_v5  ;;  %v766_v5 = vmul.f32 %v1142_v63, %v1142_v63 }
 0xbae   :  { %v767_v10 = vsub.f32 1.0, %v766_v5 }
 0xbb0   :  { %v768_v11 = vmul.f32 0.1, %v767_v10 }
 0xc2a   :  { %v736_v2 = vpop.f32.mrf.mxu2 }
 0xc2b   :  { %v737_v7 = vadd.f32 %v1289_v31, %v736_v2 }
 0xc2d   :  { %v742_v6 = vsub.f32 %v737_v7, %v1087_v4 }
 0xc2f   :  { %744 = vrot.lane.b32.xlu2 %v742_v6, %s1156_s28  ;;  %v749_v8 = vpack.c.bf16 %v742_v6, %v742_v6 }
 0xc31   :  { %1088 = vmatmul.msk.bf16.vlgmr.msrb.gmra.mxu1 %vm164_vm3, %v749_v8 }
 0xc32   :  { %v738_v9 = vpop.f32.mrf.mxu2  ;;  %936 = vmatpush.bf16.msrb.mxu1 %v1225_v3 }
 0xc89   :  { %v745_v1 = vpop.permute.xlu2 %744 }
 0xc8a   :  { %748 = vst.msk [vmem:[%s1460_s10] sm:$0xff] %vm747_vm8, %v745_v1 }
 0xcae   :  { %v762_v14 = vpop.f32.mrf.mxu1 }
 0xcaf   :  { %v769_v16 = vmul.f32 %v768_v11, %v762_v14 }
 0xcb1   :  { %v770_v17 = vsub.f32 %v721_v62, %v769_v16 }
 0xcb3   :  { %v771_v18 = vsub.f32 %v721_v62, %v770_v17  ;;  %1143 = vtanh.f32 %v770_v17 }
 0xcb5   :  { %v772_v19 = vmul.f32 0.1, %v771_v18 }
 0xcb6   :  { %v764_v20 = vpop.f32.mrf.mxu1 }
 0xcb7   :  { %v773_v21 = vsub.f32 %v720_v61, %v772_v19 }
 0xcb9   :  { %v1144_v22 = vpop.eup %1143  ;;  %v774_v23 = vsub.f32 %v720_v61, %v773_v21  ;;  %v829_v37 = vmul.f32 0.5, %v773_v21 }
 0xcba   :  { %v796_v3 = vpack.c.bf16 %v1144_v22, %v1144_v22  ;;  %v1099_v22 = vld [vmem:[%s1459_s0 + $0x38] sm:$0xff] }
 0xcbb   :  { %v775_v24 = vpack.c.bf16 %v774_v23, %v774_v23 }
 0xcbc   :  { %1090 = vmatmul.msk.bf16.vlgmr.msrb.gmra.mxu0 %vm41_vm2, %v796_v3 }
 0xcbd   :  { %1089 = vmatmul.msk.bf16.vlgmr.msrb.gmra.mxu3 %vm41_vm2, %v775_v24  ;;  %986 = vmatpush.bf16.msrb.mxu0 %v1275_v29 }
 0xcbe   :  { %959 = vmatpush.bf16.msrb.mxu3 %v1253_v12 }
 0xcc2   :  { %960 = vmatpush.bf16.msrb.mxu3 %v1259_v13 }
 0xd39   :  { %v809_v25 = vpop.f32.mrf.mxu0 }
 0xd40   :  { %v788_v26 = vpop.f32.mrf.mxu3 }
 0xd41   :  { %v792_v27 = vmul.f32 0.01, %v788_v26  ;;  %v811_v28 = vpop.f32.mrf.mxu0 }
 0xd43   :  { %v793_v32 = vsub.f32 %v680_v49, %v792_v27 }
 0xd45   :  { %v794_v33 = vpack.c.bf16 %v793_v32, %v793_v32 }
 0xd47   :  { %1091 = vmatmul.msk.bf16.vlgmr.msrb.gmra.mxu2 %vm45_vm1, %v794_v33 }
 0xd48   :  { %v790_v34 = vpop.f32.mrf.mxu3  ;;  %1011 = vmatpush.bf16.msrb.mxu2 %v1282_v30  ;;  %v1093_v30 = vld [vmem:[%s1459_s0 + $0x30] sm:$0xff] }
 0xd4c   :  { %1012 = vmatpush.bf16.msrb.mxu2 %v1304_v38 }
 0xdca   :  { %v825_v35 = vpop.f32.mrf.mxu2 }
 0xdcb   :  { %v826_v36 = vadd.f32 %v825_v35, %v809_v25 }
 0xdcd   :  { %v830_v29 = vadd.f32 %v1267_v15, %v826_v36 }
 0xdcf   :  { %v831_v12 = vsub.f32 %v830_v29, %v770_v17 }
 0xdd1   :  { %v832_v13 = vmul.f32 0.5, %v831_v12 }
 0xdd2   :  { %v827_v39 = vpop.f32.mrf.mxu2 }
 0xdd3   :  { %v833_v40 = vadd.f32 %v832_v13, %v829_v37 }
 0xdd5   :  { %v834_v41 = vadd.f32 %v833_v40, %v770_v17 }
 0xdd7   :  { %1145 = vtanh.f32 %v834_v41 }
 0xddd   :  { %v1146_v42 = vpop.eup %1145 }
 0xdde   :  { %v836_v43 = vpack.c.bf16 %v1146_v42, %v1146_v42  ;;  %v879_v49 = vmul.f32 %v1146_v42, %v1146_v42 }
 0xde0   :  { %1092 = vmatmul.msk.bf16.vlgmr.msra.gmra.mxu1 %vm41_vm2, %v836_v43  ;;  %v880_v50 = vsub.f32 1.0, %v879_v49 }
 0xde2   :  { %v881_v51 = vmul.f32 0.1, %v880_v50 }
 0xe5d   :  { %v849_v44 = vpop.f32.mrf.mxu1 }
 0xe5e   :  { %v850_v38 = vadd.f32 %v1289_v31, %v849_v44 }
 0xe60   :  { %v855_v45 = vsub.f32 %v850_v38, %v1093_v30 }
 0xe62   :  { %v862_v46 = vpack.c.bf16 %v855_v45, %v855_v45  ;;  %857 = vrot.lane.b32.xlu2 %v855_v45, %s1157_s9 }
 0xe64   :  { %1094 = vmatmul.msk.bf16.vlgmr.msra.gmra.mxu3 %vm164_vm3, %v862_v46 }
 0xe65   :  { %v851_v47 = vpop.f32.mrf.mxu1 }
 0xebc   :  { %v858_v48 = vpop.permute.xlu2 %857 }
 0xebd   :  { %861 = vst.msk [vmem:[%s1460_s10] sm:$0xff] %vm860_vm9, %v858_v48 }
 0xee7   :  { %v875_v52 = vpop.f32.mrf.mxu3 }
 0xee8   :  { %v882_v53 = vmul.f32 %v881_v51, %v875_v52 }
 0xeea   :  { %v883_v54 = vsub.f32 %v834_v41, %v882_v53 }
 0xeec   :  { %v884_v55 = vsub.f32 %v834_v41, %v883_v54  ;;  %1147 = vtanh.f32 %v883_v54 }
 0xeee   :  { %v885_v56 = vmul.f32 0.1, %v884_v55 }
 0xeef   :  { %v877_v57 = vpop.f32.mrf.mxu3 }
 0xef0   :  { %v886_v58 = vsub.f32 %v833_v40, %v885_v56 }
 0xef2   :  { %v1148_v59 = vpop.eup %1147  ;;  %v887_v60 = vsub.f32 %v833_v40, %v886_v58  ;;  %v942_v11 = vmul.f32 0.5, %v886_v58 }
 0xef3   :  { %v909_v61 = vpack.c.bf16 %v1148_v59, %v1148_v59 }
 0xef4   :  { %v888_v62 = vpack.c.bf16 %v887_v60, %v887_v60 }
 0xef5   :  { %1096 = vmatmul.msk.bf16.vlgmr.msra.gmra.mxu2 %vm41_vm2, %v909_v61 }
 0xef6   :  { %1095 = vmatmul.msk.bf16.vlgmr.msra.gmra.mxu0 %vm41_vm2, %v888_v62 }
 0xf73   :  { %v901_v63 = vpop.f32.mrf.mxu0 }
 0xf74   :  { %v905_v0 = vmul.f32 0.01, %v901_v63 }
 0xf76   :  { %v906_v2 = vsub.f32 %v793_v32, %v905_v0 }
 0xf78   :  { %v907_v4 = vpack.c.bf16 %v906_v2, %v906_v2  ;;  %v922_v7 = vpop.f32.mrf.mxu2 }
 0xf7a   :  { %1097 = vmatmul.msk.bf16.vlgmr.msrb.gmra.mxu1 %vm45_vm1, %v907_v4 }
 0xf7b   :  { %v903_v6 = vpop.f32.mrf.mxu0 }
 0xf80   :  { %v924_v8 = vpop.f32.mrf.mxu2 }
 0xff7   :  { %v938_v9 = vpop.f32.mrf.mxu1 }
 0xff8   :  { %v939_v1 = vadd.f32 %v938_v9, %v922_v7 }
 0xffa   :  { %v943_v5 = vadd.f32 %v1267_v15, %v939_v1 }
 0xffc   :  { %v944_v10 = vsub.f32 %v943_v5, %v883_v54 }
 0xffe   :  { %v945_v14 = vmul.f32 0.5, %v944_v10 }
 0xfff   :  { %v940_v16 = vpop.f32.mrf.mxu1 }
0x1000   :  { %v946_v17 = vadd.f32 %v945_v14, %v942_v11 }
0x1002   :  { %v947_v18 = vadd.f32 %v946_v17, %v883_v54 }
0x1004   :  { %1149 = vtanh.f32 %v947_v18 }
0x100a   :  { %v1150_v19 = vpop.eup %1149 }
0x100b   :  { %v949_v20 = vpack.c.bf16 %v1150_v19, %v1150_v19  ;;  %v992_v26 = vmul.f32 %v1150_v19, %v1150_v19 }
0x100d   :  { %1098 = vmatmul.msk.bf16.vlgmr.msrb.gmra.mxu3 %vm41_vm2, %v949_v20  ;;  %v993_v27 = vsub.f32 1.0, %v992_v26 }
0x100f   :  { %v994_v28 = vmul.f32 0.1, %v993_v27 }
0x1090   :  { %v962_v21 = vpop.f32.mrf.mxu3 }
0x1091   :  { %v963_v23 = vadd.f32 %v1289_v31, %v962_v21 }
0x1093   :  { %v968_v3 = vsub.f32 %v963_v23, %v1099_v22 }
0x1095   :  { %v975_v15 = vpack.c.bf16 %v968_v3, %v968_v3  ;;  %970 = vrot.lane.b32.xlu0 %v968_v3, %s1158_s15 }
0x1097   :  { %1100 = vmatmul.msk.bf16.vlgmr.msrb.gmra.mxu0 %vm164_vm3, %v975_v15 }
0x1098   :  { %v964_v24 = vpop.f32.mrf.mxu3 }
0x1107   :  { %v971_v25 = vpop.permute.xlu0 %970 }
0x1108   :  { %974 = vst.msk [vmem:[%s1460_s10] sm:$0xff] %vm973_vm10, %v971_v25 }
0x1114   :  { %v988_v32 = vpop.f32.mrf.mxu0 }
0x1115   :  { %v995_v33 = vmul.f32 %v994_v28, %v988_v32 }
0x1117   :  { %v996_v34 = vsub.f32 %v947_v18, %v995_v33 }
0x1119   :  { %v997_v31 = vsub.f32 %v947_v18, %v996_v34  ;;  %1020 = vst.msk [vmem:[#allocation2] sm:$0xff] %vm41_vm2, %v996_v34 }
0x111b   :  { %v998_v35 = vmul.f32 0.1, %v997_v31 }
0x111c   :  { %v990_v36 = vpop.f32.mrf.mxu0 }
0x111d   :  { %v999_v29 = vsub.f32 %v946_v17, %v998_v35 }
0x111f   :  { %v1000_v12 = vsub.f32 %v946_v17, %v999_v29  ;;  %1021 = vst.msk [vmem:[#allocation3] sm:$0xff] %vm41_vm2, %v999_v29 }
0x1121   :  { %v1001_v37 = vpack.c.bf16 %v1000_v12, %v1000_v12 }
0x1123   :  { %1101 = vmatmul.msk.bf16.vlgmr.msrb.gmra.mxu2 %vm41_vm2, %v1001_v37 }
0x11a6   :  { %v1014_v13 = vpop.f32.mrf.mxu2 }
0x11a7   :  { %v1018_v39 = vmul.f32 0.01, %v1014_v13 }
0x11a9   :  { %v1019_v40 = vsub.f32 %v906_v2, %v1018_v39 }
0x11ab   :  { %1022 = vst.msk [vmem:[#allocation4] sm:$0xff] %vm45_vm1, %v1019_v40 }
0x11ae   :  { %v1016_v41 = vpop.f32.mrf.mxu2 }

</bundles_post_ra>
